<compile_context>
chip_gen: v7x
topology: tpu7x:2x2x1
jax: 0.10.0
libtpu: 0.0.40
codegen_flags: <defaults>
</compile_context>

<pallas_src>
import jax
import jax.numpy as jnp
from jax import lax
from jax.experimental import pallas as pl
from jax.experimental.pallas import tpu as pltpu

LEAK = 0.2      # nn.LeakyReLU(0.2)
EPS = 1e-10     # GroupBatchnorm2d eps (added to the std, not the variance)
GROUPS = 2      # GroupBatchnorm2d group count (must divide planes)


def _leaky(x):
    return jnp.where(x > 0, x, LEAK * x)


def _make_kernel(bb, h, w, groups):
    hw = h * w

    def kernel(x_ref, w1_ref, g1_ref, b1_ref, w2_ref, g2_ref, b2_ref, o_ref):
        c = x_ref.shape[1]
        cg = c // groups
        cnt = cg * hw

        # ---- hoisted tap-validity masks (depend only on the pixel index) ----
        p = lax.broadcasted_iota(jnp.int32, (1, hw), 1)
        x_idx = p % w
        not_left = x_idx != 0                 # dx = -1 invalid at x == 0
        not_right = x_idx != (w - 1)          # dx = +1 invalid at x == W-1
        not_top = p >= w                      # dy = -1 invalid at y == 0
        not_bot = p < (h - 1) * w             # dy = +1 invalid at y == H-1

        tap_masks = []
        for k in range(9):
            dy, dx = k // 3 - 1, k % 3 - 1
            m = None
            for cond in ((not_top if dy == -1 else not_bot if dy == 1 else None),
                         (not_left if dx == -1 else not_right if dx == 1 else None)):
                if cond is not None:
                    m = cond if m is None else jnp.logical_and(m, cond)
            tap_masks.append(m)

        # tiny block-invariant params, loaded once
        w1 = w1_ref[...]
        w2 = w2_ref[...]
        g1 = g1_ref[...]
        b1 = b1_ref[...]
        g2 = g2_ref[...]
        b2 = b2_ref[...]

        def conv3x3(src_f32, w_val):
            """(C, HW) f32 -> (C, HW) f32 via ONE MXU matmul (K = 9*C).

            Taps are lane rotations (XLU) of the source plus validity masks;
            the (9C, HW) im2col operand lives entirely in registers."""
            taps = []
            for k in range(9):
                dy, dx = k // 3 - 1, k % 3 - 1
                off = dy * w + dx
                t = src_f32 if off == 0 else pltpu.roll(src_f32, (-off) % hw, axis=1)
                if tap_masks[k] is not None:
                    t = jnp.where(tap_masks[k], t, 0.0)
                taps.append(t.astype(jnp.bfloat16))
            col = jnp.concatenate(taps, axis=0)            # (9C, HW), bf16, registers
            return jnp.dot(w_val, col, preferred_element_type=jnp.float32)

        def group_norm(y, gamma, beta):
            """GroupBatchnorm2d on one sample's (C, HW) tile, two-pass stats."""
            parts = []
            for g in range(groups):
                blk = y[g * cg:(g + 1) * cg, :]
                mean = jnp.sum(blk) / cnt
                d = blk - mean
                var = jnp.sum(d * d) / (cnt - 1)           # unbiased (torch .std())
                inv = 1.0 / (jnp.sqrt(var) + EPS)          # eps added to the std
                parts.append(d * (inv * gamma[g * cg:(g + 1) * cg, :])
                             + beta[g * cg:(g + 1) * cg, :])
            return jnp.concatenate(parts, axis=0)

        # Bb samples of this batch block, processed back-to-back; every
        # per-sample intermediate dies at the end of its iteration.
        for b in range(bb):
            x_b = x_ref[b].astype(jnp.float32)                        # (C, HW)
            h1 = _leaky(group_norm(conv3x3(x_b, w1), g1, b1))
            y2 = group_norm(conv3x3(h1, w2), g2, b2)
            # re-read x for the residual instead of holding it across both convs
            o_ref[b] = _leaky(y2 + x_ref[b].astype(jnp.float32))

    return kernel


def _pick_batch_block(n, max_bb=8):
    """Largest divisor of n that is <= max_bb (amortize per-grid-step overhead)."""
    bb = 1
    for d in range(1, min(n, max_bb) + 1):
        if n % d == 0:
            bb = d
    return bb


def basic_block_forward(x_nchw, params, groups=GROUPS):
    """Fused Pallas BasicBlock forward. Input/output are NCHW (PyTorch layout)."""
    n, c, h, w = x_nchw.shape
    hw = h * w
    assert c % groups == 0, "GroupBatchnorm2d requires groups | planes"
    assert hw % 128 == 0, "kernel assumes H*W is a multiple of 128 (lane-dense tiles)"
    # TODO(synk): stride != 1 and the explicit `downsample` branch are not
    # implemented; the identity residual requires inplanes == planes.
    bb = _pick_batch_block(n)

    # free reshape of NCHW; bf16 HBM<->VMEM for activations (conv operands are
    # bf16 on the MXU anyway); all in-kernel math stays f32.
    x = x_nchw.reshape(n, c, hw).astype(jnp.bfloat16)

    kernel = _make_kernel(bb, h, w, groups)
    full = lambda i: (0, 0)
    out = pl.pallas_call(
        kernel,
        out_shape=jax.ShapeDtypeStruct((n, c, hw), jnp.float32),
        grid=(n // bb,),
        in_specs=[
            pl.BlockSpec((bb, c, hw), lambda i: (i, 0, 0)),    # x (bf16)
            pl.BlockSpec((c, 9 * c), full),                    # w1 (bf16, tap-stacked)
            pl.BlockSpec((c, 1), full),                        # gamma1
            pl.BlockSpec((c, 1), full),                        # beta1
            pl.BlockSpec((c, 9 * c), full),                    # w2 (bf16, tap-stacked)
            pl.BlockSpec((c, 1), full),                        # gamma2
            pl.BlockSpec((c, 1), full),                        # beta2
        ],
        out_specs=pl.BlockSpec((bb, c, hw), lambda i: (i, 0, 0)),
        compiler_params=pltpu.CompilerParams(
            dimension_semantics=("parallel",)),
    )(x, params["w1"], params["g1"], params["b1"],
      params["w2"], params["g2"], params["b2"])
    return out.reshape(n, c, h, w)


# ---------------------------- parameter creation ------------------------------

def init_params(key, inplanes, planes):
    assert inplanes == planes, "identity residual requires inplanes == planes"
    ks = jax.random.split(key, 4)

    def conv_w(k, cout, cin):
        fan = 3 * 3 * cout
        return jax.random.normal(k, (cout, cin, 3, 3), jnp.float32) * jnp.sqrt(2.0 / fan)

    def stack(w_t):
        # torch OIHW (O, I, 3, 3) -> (O, 9*I); tap-major blocks of I channels,
        # tap index k = ky*3 + kx, matching the kernel's im2col layout.
        o, i = w_t.shape[0], w_t.shape[1]
        return jnp.transpose(w_t, (0, 2, 3, 1)).reshape(o, 9 * i).astype(jnp.bfloat16)

    w1_t = conv_w(ks[0], planes, inplanes)
    w2_t = conv_w(ks[1], planes, planes)
    return dict(
        w1_t=w1_t, w2_t=w2_t,                         # torch-layout f32 (reference)
        w1=stack(w1_t), w2=stack(w2_t),               # kernel-layout bf16
        # GroupBatchnorm2d affine params (gamma ~ randn, beta = 0, as in the module)
        g1=jax.random.normal(ks[2], (planes, 1), jnp.float32),
        b1=jnp.zeros((planes, 1), jnp.float32),
        g2=jax.random.normal(ks[3], (planes, 1), jnp.float32),
        b2=jnp.zeros((planes, 1), jnp.float32),
    )


# ------------------------------ pure-JAX reference ----------------------------

def ref_forward(x, p):
    def conv(a, w):
        return lax.conv_general_dilated(
            a, w, (1, 1), [(1, 1), (1, 1)],
            dimension_numbers=("NCHW", "OIHW", "NCHW"))

    def gn(a, gamma, beta):
        n, c, hh, ww = a.shape
        xg = a.reshape(n, GROUPS, -1)
        mean = xg.mean(axis=2, keepdims=True)
        var = jnp.sum((xg - mean) ** 2, axis=2, keepdims=True) / (xg.shape[2] - 1)
        xn = (xg - mean) / (jnp.sqrt(var) + EPS)
        return (xn.reshape(n, c, hh, ww) * gamma.reshape(1, c, 1, 1)
                + beta.reshape(1, c, 1, 1))

    def lrelu(a):
        return jnp.where(a > 0, a, LEAK * a)

    out = lrelu(gn(conv(x, p["w1_t"]), p["g1"], p["b1"]))
    out = gn(conv(out, p["w2_t"]), p["g2"], p["b2"])
    return lrelu(out + x)


# ----------------------------------- main --------------------------------------

if __name__ == "__main__":
    inplanes = planes = 16
    N, H, W = 2, 16, 16

    key = jax.random.PRNGKey(0)
    kx, kp = jax.random.split(key)
    x = jax.random.normal(kx, (N, inplanes, H, W), jnp.float32)   # NCHW input
    params = init_params(kp, inplanes, planes)

    out = jax.block_until_ready(jax.jit(basic_block_forward)(x, params))
    ref = jax.block_until_ready(ref_forward(x, params))

    assert out.shape == (N, planes, H, W)
    assert bool(jnp.allclose(out, ref, atol=5e-2, rtol=5e-2)), "mismatch vs reference"
    print("KERNEL_OK")
</pallas_src>

<mosaic_0001>
module attributes {stable_mosaic.version = 11 : i64} {
  func.func @kernel(%arg0: i32, %arg1: memref<2x16x256xbf16, #tpu.memory_space<vmem>>, %arg2: memref<16x144xbf16, #tpu.memory_space<vmem>>, %arg3: memref<16x1xf32, #tpu.memory_space<vmem>>, %arg4: memref<16x1xf32, #tpu.memory_space<vmem>>, %arg5: memref<16x144xbf16, #tpu.memory_space<vmem>>, %arg6: memref<16x1xf32, #tpu.memory_space<vmem>>, %arg7: memref<16x1xf32, #tpu.memory_space<vmem>>, %arg8: memref<2x16x256xf32, #tpu.memory_space<vmem>>) attributes {dimension_semantics = [#tpu.dimension_semantics<parallel>], iteration_bounds = array<i64: 1>, scalar_prefetch = 0 : i64, scratch_operands = 0 : i64, tpu.core_type = #tpu.core_type<tc>, window_params = [{transform_indices = @transform_0, window_bounds = array<i64: 2, 16, 256>}, {pipeline_mode = #tpu.pipeline_mode<synchronous>, transform_indices = @transform_1, window_bounds = array<i64: 16, 144>}, {pipeline_mode = #tpu.pipeline_mode<synchronous>, transform_indices = @transform_2, window_bounds = array<i64: 16, 1>}, {pipeline_mode = #tpu.pipeline_mode<synchronous>, transform_indices = @transform_3, window_bounds = array<i64: 16, 1>}, {pipeline_mode = #tpu.pipeline_mode<synchronous>, transform_indices = @transform_4, window_bounds = array<i64: 16, 144>}, {pipeline_mode = #tpu.pipeline_mode<synchronous>, transform_indices = @transform_5, window_bounds = array<i64: 16, 1>}, {pipeline_mode = #tpu.pipeline_mode<synchronous>, transform_indices = @transform_6, window_bounds = array<i64: 16, 1>}, {transform_indices = @transform_7, window_bounds = array<i64: 2, 16, 256>}]} {
    %0 = tpu.iota {dimensions = array<i32: 1>} : vector<1x256xi32>
    %c16_i32 = arith.constant 16 : i32
    %c0_i32 = arith.constant 0 : i32
    %1 = arith.cmpi eq, %c16_i32, %c0_i32 : i32
    %c1_i32 = arith.constant 1 : i32
    %2 = arith.select %1, %c1_i32, %c16_i32 : i32
    %3 = vector.broadcast %2 : i32 to vector<1x256xi32>
    %4 = arith.remsi %0, %3 : vector<1x256xi32>
    %c0_i32_0 = arith.constant 0 : i32
    %5 = vector.broadcast %c0_i32_0 : i32 to vector<1x256xi32>
    %6 = arith.cmpi ne, %4, %5 : vector<1x256xi32>
    %c0_i32_1 = arith.constant 0 : i32
    %7 = vector.broadcast %c0_i32_1 : i32 to vector<1x256xi32>
    %8 = arith.cmpi slt, %4, %7 : vector<1x256xi32>
    %c0_i32_2 = arith.constant 0 : i32
    %9 = arith.cmpi slt, %2, %c0_i32_2 : i32
    %10 = vector.broadcast %9 : i1 to vector<1x256xi1>
    %11 = vector.broadcast %10 : vector<1x256xi1> to vector<1x256xi1>
    %12 = arith.xori %8, %11 : vector<1x256xi1>
    %13 = arith.andi %12, %6 : vector<1x256xi1>
    %14 = vector.broadcast %2 : i32 to vector<1x256xi32>
    %15 = arith.addi %4, %14 : vector<1x256xi32>
    %16 = arith.select %13, %15, %4 : vector<1x256xi1>, vector<1x256xi32>
    %c0_i32_3 = arith.constant 0 : i32
    %17 = vector.broadcast %c0_i32_3 : i32 to vector<1x256xi32>
    %18 = arith.cmpi ne, %16, %17 : vector<1x256xi32>
    %c15_i32 = arith.constant 15 : i32
    %19 = vector.broadcast %c15_i32 : i32 to vector<1x256xi32>
    %20 = arith.cmpi ne, %16, %19 : vector<1x256xi32>
    %c16_i32_4 = arith.constant 16 : i32
    %21 = vector.broadcast %c16_i32_4 : i32 to vector<1x256xi32>
    %22 = arith.cmpi sge, %0, %21 : vector<1x256xi32>
    %c240_i32 = arith.constant 240 : i32
    %23 = vector.broadcast %c240_i32 : i32 to vector<1x256xi32>
    %24 = arith.cmpi slt, %0, %23 : vector<1x256xi32>
    %25 = arith.andi %22, %18 : vector<1x256xi1>
    %26 = arith.andi %22, %20 : vector<1x256xi1>
    %27 = arith.andi %24, %18 : vector<1x256xi1>
    %28 = arith.andi %24, %20 : vector<1x256xi1>
    %c0 = arith.constant 0 : index
    %c0_5 = arith.constant 0 : index
    %29 = vector.load %arg2[%c0, %c0_5] : memref<16x144xbf16, #tpu.memory_space<vmem>>, vector<16x144xbf16>
    %c0_6 = arith.constant 0 : index
    %c0_7 = arith.constant 0 : index
    %30 = vector.load %arg5[%c0_6, %c0_7] : memref<16x144xbf16, #tpu.memory_space<vmem>>, vector<16x144xbf16>
    %c0_8 = arith.constant 0 : index
    %c0_9 = arith.constant 0 : index
    %31 = vector.load %arg3[%c0_8, %c0_9] : memref<16x1xf32, #tpu.memory_space<vmem>>, vector<16x1xf32>
    %c0_10 = arith.constant 0 : index
    %c0_11 = arith.constant 0 : index
    %32 = vector.load %arg4[%c0_10, %c0_11] : memref<16x1xf32, #tpu.memory_space<vmem>>, vector<16x1xf32>
    %c0_12 = arith.constant 0 : index
    %c0_13 = arith.constant 0 : index
    %33 = vector.load %arg6[%c0_12, %c0_13] : memref<16x1xf32, #tpu.memory_space<vmem>>, vector<16x1xf32>
    %c0_14 = arith.constant 0 : index
    %c0_15 = arith.constant 0 : index
    %34 = vector.load %arg7[%c0_14, %c0_15] : memref<16x1xf32, #tpu.memory_space<vmem>>, vector<16x1xf32>
    %c0_16 = arith.constant 0 : index
    %c0_17 = arith.constant 0 : index
    %c0_18 = arith.constant 0 : index
    %35 = vector.load %arg1[%c0_16, %c0_17, %c0_18] : memref<2x16x256xbf16, #tpu.memory_space<vmem>>, vector<1x16x256xbf16>
    %36 = vector.shape_cast %35 : vector<1x16x256xbf16> to vector<16x256xbf16>
    %37 = arith.extf %36 : vector<16x256xbf16> to vector<16x256xf32>
    %c17_i32 = arith.constant 17 : i32
    %38 = tpu.dynamic_rotate %37 by %c17_i32 dim 1 : vector<16x256xf32>, i32 -> vector<16x256xf32>
    %cst = arith.constant 0.000000e+00 : f32
    %39 = vector.shape_cast %25 : vector<1x256xi1> to vector<1x256xi1>
    %40 = vector.broadcast %39 : vector<1x256xi1> to vector<16x256xi1>
    %41 = vector.broadcast %cst : f32 to vector<16x256xf32>
    %42 = arith.select %40, %38, %41 : vector<16x256xi1>, vector<16x256xf32>
    %43 = arith.truncf %42 : vector<16x256xf32> to vector<16x256xbf16>
    %c16_i32_19 = arith.constant 16 : i32
    %44 = tpu.dynamic_rotate %37 by %c16_i32_19 dim 1 : vector<16x256xf32>, i32 -> vector<16x256xf32>
    %cst_20 = arith.constant 0.000000e+00 : f32
    %45 = vector.shape_cast %22 : vector<1x256xi1> to vector<1x256xi1>
    %46 = vector.broadcast %45 : vector<1x256xi1> to vector<16x256xi1>
    %47 = vector.broadcast %cst_20 : f32 to vector<16x256xf32>
    %48 = arith.select %46, %44, %47 : vector<16x256xi1>, vector<16x256xf32>
    %49 = arith.truncf %48 : vector<16x256xf32> to vector<16x256xbf16>
    %c15_i32_21 = arith.constant 15 : i32
    %50 = tpu.dynamic_rotate %37 by %c15_i32_21 dim 1 : vector<16x256xf32>, i32 -> vector<16x256xf32>
    %cst_22 = arith.constant 0.000000e+00 : f32
    %51 = vector.shape_cast %26 : vector<1x256xi1> to vector<1x256xi1>
    %52 = vector.broadcast %51 : vector<1x256xi1> to vector<16x256xi1>
    %53 = vector.broadcast %cst_22 : f32 to vector<16x256xf32>
    %54 = arith.select %52, %50, %53 : vector<16x256xi1>, vector<16x256xf32>
    %55 = arith.truncf %54 : vector<16x256xf32> to vector<16x256xbf16>
    %c1_i32_23 = arith.constant 1 : i32
    %56 = tpu.dynamic_rotate %37 by %c1_i32_23 dim 1 : vector<16x256xf32>, i32 -> vector<16x256xf32>
    %cst_24 = arith.constant 0.000000e+00 : f32
    %57 = vector.shape_cast %18 : vector<1x256xi1> to vector<1x256xi1>
    %58 = vector.broadcast %57 : vector<1x256xi1> to vector<16x256xi1>
    %59 = vector.broadcast %cst_24 : f32 to vector<16x256xf32>
    %60 = arith.select %58, %56, %59 : vector<16x256xi1>, vector<16x256xf32>
    %61 = arith.truncf %60 : vector<16x256xf32> to vector<16x256xbf16>
    %62 = arith.truncf %37 : vector<16x256xf32> to vector<16x256xbf16>
    %c255_i32 = arith.constant 255 : i32
    %63 = tpu.dynamic_rotate %37 by %c255_i32 dim 1 : vector<16x256xf32>, i32 -> vector<16x256xf32>
    %cst_25 = arith.constant 0.000000e+00 : f32
    %64 = vector.shape_cast %20 : vector<1x256xi1> to vector<1x256xi1>
    %65 = vector.broadcast %64 : vector<1x256xi1> to vector<16x256xi1>
    %66 = vector.broadcast %cst_25 : f32 to vector<16x256xf32>
    %67 = arith.select %65, %63, %66 : vector<16x256xi1>, vector<16x256xf32>
    %68 = arith.truncf %67 : vector<16x256xf32> to vector<16x256xbf16>
    %c241_i32 = arith.constant 241 : i32
    %69 = tpu.dynamic_rotate %37 by %c241_i32 dim 1 : vector<16x256xf32>, i32 -> vector<16x256xf32>
    %cst_26 = arith.constant 0.000000e+00 : f32
    %70 = vector.shape_cast %27 : vector<1x256xi1> to vector<1x256xi1>
    %71 = vector.broadcast %70 : vector<1x256xi1> to vector<16x256xi1>
    %72 = vector.broadcast %cst_26 : f32 to vector<16x256xf32>
    %73 = arith.select %71, %69, %72 : vector<16x256xi1>, vector<16x256xf32>
    %74 = arith.truncf %73 : vector<16x256xf32> to vector<16x256xbf16>
    %c240_i32_27 = arith.constant 240 : i32
    %75 = tpu.dynamic_rotate %37 by %c240_i32_27 dim 1 : vector<16x256xf32>, i32 -> vector<16x256xf32>
    %cst_28 = arith.constant 0.000000e+00 : f32
    %76 = vector.shape_cast %24 : vector<1x256xi1> to vector<1x256xi1>
    %77 = vector.broadcast %76 : vector<1x256xi1> to vector<16x256xi1>
    %78 = vector.broadcast %cst_28 : f32 to vector<16x256xf32>
    %79 = arith.select %77, %75, %78 : vector<16x256xi1>, vector<16x256xf32>
    %80 = arith.truncf %79 : vector<16x256xf32> to vector<16x256xbf16>
    %c239_i32 = arith.constant 239 : i32
    %81 = tpu.dynamic_rotate %37 by %c239_i32 dim 1 : vector<16x256xf32>, i32 -> vector<16x256xf32>
    %cst_29 = arith.constant 0.000000e+00 : f32
    %82 = vector.shape_cast %28 : vector<1x256xi1> to vector<1x256xi1>
    %83 = vector.broadcast %82 : vector<1x256xi1> to vector<16x256xi1>
    %84 = vector.broadcast %cst_29 : f32 to vector<16x256xf32>
    %85 = arith.select %83, %81, %84 : vector<16x256xi1>, vector<16x256xf32>
    %86 = arith.truncf %85 : vector<16x256xf32> to vector<16x256xbf16>
    %87 = tpu.concatenate %43, %49, %55, %61, %62, %68, %74, %80, %86 in 0 : vector<16x256xbf16>, vector<16x256xbf16>, vector<16x256xbf16>, vector<16x256xbf16>, vector<16x256xbf16>, vector<16x256xbf16>, vector<16x256xbf16>, vector<16x256xbf16>, vector<16x256xbf16> -> vector<144x256xbf16>
    %cst_30 = arith.constant dense<0.000000e+00> : vector<16x256xf32>
    %88 = tpu.matmul %29, %87, %cst_30 {dimension_numbers = #tpu.dot_dimension_numbers<[1], [0], [0], [1], [0, 0, 1, 1], [], []>} : vector<16x144xbf16>, vector<144x256xbf16>, vector<16x256xf32> -> vector<16x256xf32>
    %89 = vector.extract_strided_slice %88 {offsets = [0, 0], sizes = [8, 256], strides = [1, 1]} : vector<16x256xf32> to vector<8x256xf32>
    %90 = vector.shape_cast %89 : vector<8x256xf32> to vector<1x8x256xf32>
    %cst_31 = arith.constant dense<0.000000e+00> : vector<1xf32>
    %91 = vector.multi_reduction <add>, %90, %cst_31 [1, 2] : vector<1x8x256xf32> to vector<1xf32>
    %92 = vector.shape_cast %91 : vector<1xf32> to vector<1x1x1xf32>
    %93 = vector.extract %92[0, 0, 0] : f32 from vector<1x1x1xf32>
    %cst_32 = arith.constant 2.048000e+03 : f32
    %94 = arith.divf %93, %cst_32 : f32
    %95 = vector.broadcast %94 : f32 to vector<8x256xf32>
    %96 = arith.subf %89, %95 : vector<8x256xf32>
    %97 = arith.mulf %96, %96 : vector<8x256xf32>
    %98 = vector.shape_cast %97 : vector<8x256xf32> to vector<1x8x256xf32>
    %cst_33 = arith.constant dense<0.000000e+00> : vector<1xf32>
    %99 = vector.multi_reduction <add>, %98, %cst_33 [1, 2] : vector<1x8x256xf32> to vector<1xf32>
    %100 = vector.shape_cast %99 : vector<1xf32> to vector<1x1x1xf32>
    %101 = vector.extract %100[0, 0, 0] : f32 from vector<1x1x1xf32>
    %cst_34 = arith.constant 2.047000e+03 : f32
    %102 = arith.divf %101, %cst_34 : f32
    %103 = math.sqrt %102 : f32
    %cst_35 = arith.constant 1.000000e-10 : f32
    %104 = arith.addf %103, %cst_35 : f32
    %cst_36 = arith.constant 1.000000e+00 : f32
    %105 = arith.divf %cst_36, %104 : f32
    %106 = vector.extract_strided_slice %31 {offsets = [0, 0], sizes = [8, 1], strides = [1, 1]} : vector<16x1xf32> to vector<8x1xf32>
    %107 = vector.broadcast %105 : f32 to vector<8x1xf32>
    %108 = arith.mulf %107, %106 : vector<8x1xf32>
    %109 = vector.broadcast %108 : vector<8x1xf32> to vector<8x256xf32>
    %110 = arith.mulf %96, %109 : vector<8x256xf32>
    %111 = vector.extract_strided_slice %32 {offsets = [0, 0], sizes = [8, 1], strides = [1, 1]} : vector<16x1xf32> to vector<8x1xf32>
    %112 = vector.broadcast %111 : vector<8x1xf32> to vector<8x256xf32>
    %113 = arith.addf %110, %112 : vector<8x256xf32>
    %114 = vector.extract_strided_slice %88 {offsets = [8, 0], sizes = [8, 256], strides = [1, 1]} : vector<16x256xf32> to vector<8x256xf32>
    %115 = vector.shape_cast %114 : vector<8x256xf32> to vector<1x8x256xf32>
    %cst_37 = arith.constant dense<0.000000e+00> : vector<1xf32>
    %116 = vector.multi_reduction <add>, %115, %cst_37 [1, 2] : vector<1x8x256xf32> to vector<1xf32>
    %117 = vector.shape_cast %116 : vector<1xf32> to vector<1x1x1xf32>
    %118 = vector.extract %117[0, 0, 0] : f32 from vector<1x1x1xf32>
    %cst_38 = arith.constant 2.048000e+03 : f32
    %119 = arith.divf %118, %cst_38 : f32
    %120 = vector.broadcast %119 : f32 to vector<8x256xf32>
    %121 = arith.subf %114, %120 : vector<8x256xf32>
    %122 = arith.mulf %121, %121 : vector<8x256xf32>
    %123 = vector.shape_cast %122 : vector<8x256xf32> to vector<1x8x256xf32>
    %cst_39 = arith.constant dense<0.000000e+00> : vector<1xf32>
    %124 = vector.multi_reduction <add>, %123, %cst_39 [1, 2] : vector<1x8x256xf32> to vector<1xf32>
    %125 = vector.shape_cast %124 : vector<1xf32> to vector<1x1x1xf32>
    %126 = vector.extract %125[0, 0, 0] : f32 from vector<1x1x1xf32>
    %cst_40 = arith.constant 2.047000e+03 : f32
    %127 = arith.divf %126, %cst_40 : f32
    %128 = math.sqrt %127 : f32
    %cst_41 = arith.constant 1.000000e-10 : f32
    %129 = arith.addf %128, %cst_41 : f32
    %cst_42 = arith.constant 1.000000e+00 : f32
    %130 = arith.divf %cst_42, %129 : f32
    %131 = vector.extract_strided_slice %31 {offsets = [8, 0], sizes = [8, 1], strides = [1, 1]} : vector<16x1xf32> to vector<8x1xf32>
    %132 = vector.broadcast %130 : f32 to vector<8x1xf32>
    %133 = arith.mulf %132, %131 : vector<8x1xf32>
    %134 = vector.broadcast %133 : vector<8x1xf32> to vector<8x256xf32>
    %135 = arith.mulf %121, %134 : vector<8x256xf32>
    %136 = vector.extract_strided_slice %32 {offsets = [8, 0], sizes = [8, 1], strides = [1, 1]} : vector<16x1xf32> to vector<8x1xf32>
    %137 = vector.broadcast %136 : vector<8x1xf32> to vector<8x256xf32>
    %138 = arith.addf %135, %137 : vector<8x256xf32>
    %139 = tpu.concatenate %113, %138 in 0 : vector<8x256xf32>, vector<8x256xf32> -> vector<16x256xf32>
    %cst_43 = arith.constant 0.000000e+00 : f32
    %140 = vector.broadcast %cst_43 : f32 to vector<16x256xf32>
    %141 = arith.cmpf ogt, %139, %140 : vector<16x256xf32>
    %cst_44 = arith.constant 2.000000e-01 : f32
    %142 = vector.broadcast %cst_44 : f32 to vector<16x256xf32>
    %143 = arith.mulf %142, %139 : vector<16x256xf32>
    %144 = arith.select %141, %139, %143 : vector<16x256xi1>, vector<16x256xf32>
    %c17_i32_45 = arith.constant 17 : i32
    %145 = tpu.dynamic_rotate %144 by %c17_i32_45 dim 1 : vector<16x256xf32>, i32 -> vector<16x256xf32>
    %cst_46 = arith.constant 0.000000e+00 : f32
    %146 = vector.shape_cast %25 : vector<1x256xi1> to vector<1x256xi1>
    %147 = vector.broadcast %146 : vector<1x256xi1> to vector<16x256xi1>
    %148 = vector.broadcast %cst_46 : f32 to vector<16x256xf32>
    %149 = arith.select %147, %145, %148 : vector<16x256xi1>, vector<16x256xf32>
    %150 = arith.truncf %149 : vector<16x256xf32> to vector<16x256xbf16>
    %c16_i32_47 = arith.constant 16 : i32
    %151 = tpu.dynamic_rotate %144 by %c16_i32_47 dim 1 : vector<16x256xf32>, i32 -> vector<16x256xf32>
    %cst_48 = arith.constant 0.000000e+00 : f32
    %152 = vector.shape_cast %22 : vector<1x256xi1> to vector<1x256xi1>
    %153 = vector.broadcast %152 : vector<1x256xi1> to vector<16x256xi1>
    %154 = vector.broadcast %cst_48 : f32 to vector<16x256xf32>
    %155 = arith.select %153, %151, %154 : vector<16x256xi1>, vector<16x256xf32>
    %156 = arith.truncf %155 : vector<16x256xf32> to vector<16x256xbf16>
    %c15_i32_49 = arith.constant 15 : i32
    %157 = tpu.dynamic_rotate %144 by %c15_i32_49 dim 1 : vector<16x256xf32>, i32 -> vector<16x256xf32>
    %cst_50 = arith.constant 0.000000e+00 : f32
    %158 = vector.shape_cast %26 : vector<1x256xi1> to vector<1x256xi1>
    %159 = vector.broadcast %158 : vector<1x256xi1> to vector<16x256xi1>
    %160 = vector.broadcast %cst_50 : f32 to vector<16x256xf32>
    %161 = arith.select %159, %157, %160 : vector<16x256xi1>, vector<16x256xf32>
    %162 = arith.truncf %161 : vector<16x256xf32> to vector<16x256xbf16>
    %c1_i32_51 = arith.constant 1 : i32
    %163 = tpu.dynamic_rotate %144 by %c1_i32_51 dim 1 : vector<16x256xf32>, i32 -> vector<16x256xf32>
    %cst_52 = arith.constant 0.000000e+00 : f32
    %164 = vector.shape_cast %18 : vector<1x256xi1> to vector<1x256xi1>
    %165 = vector.broadcast %164 : vector<1x256xi1> to vector<16x256xi1>
    %166 = vector.broadcast %cst_52 : f32 to vector<16x256xf32>
    %167 = arith.select %165, %163, %166 : vector<16x256xi1>, vector<16x256xf32>
    %168 = arith.truncf %167 : vector<16x256xf32> to vector<16x256xbf16>
    %169 = arith.truncf %144 : vector<16x256xf32> to vector<16x256xbf16>
    %c255_i32_53 = arith.constant 255 : i32
    %170 = tpu.dynamic_rotate %144 by %c255_i32_53 dim 1 : vector<16x256xf32>, i32 -> vector<16x256xf32>
    %cst_54 = arith.constant 0.000000e+00 : f32
    %171 = vector.shape_cast %20 : vector<1x256xi1> to vector<1x256xi1>
    %172 = vector.broadcast %171 : vector<1x256xi1> to vector<16x256xi1>
    %173 = vector.broadcast %cst_54 : f32 to vector<16x256xf32>
    %174 = arith.select %172, %170, %173 : vector<16x256xi1>, vector<16x256xf32>
    %175 = arith.truncf %174 : vector<16x256xf32> to vector<16x256xbf16>
    %c241_i32_55 = arith.constant 241 : i32
    %176 = tpu.dynamic_rotate %144 by %c241_i32_55 dim 1 : vector<16x256xf32>, i32 -> vector<16x256xf32>
    %cst_56 = arith.constant 0.000000e+00 : f32
    %177 = vector.shape_cast %27 : vector<1x256xi1> to vector<1x256xi1>
    %178 = vector.broadcast %177 : vector<1x256xi1> to vector<16x256xi1>
    %179 = vector.broadcast %cst_56 : f32 to vector<16x256xf32>
    %180 = arith.select %178, %176, %179 : vector<16x256xi1>, vector<16x256xf32>
    %181 = arith.truncf %180 : vector<16x256xf32> to vector<16x256xbf16>
    %c240_i32_57 = arith.constant 240 : i32
    %182 = tpu.dynamic_rotate %144 by %c240_i32_57 dim 1 : vector<16x256xf32>, i32 -> vector<16x256xf32>
    %cst_58 = arith.constant 0.000000e+00 : f32
    %183 = vector.shape_cast %24 : vector<1x256xi1> to vector<1x256xi1>
    %184 = vector.broadcast %183 : vector<1x256xi1> to vector<16x256xi1>
    %185 = vector.broadcast %cst_58 : f32 to vector<16x256xf32>
    %186 = arith.select %184, %182, %185 : vector<16x256xi1>, vector<16x256xf32>
    %187 = arith.truncf %186 : vector<16x256xf32> to vector<16x256xbf16>
    %c239_i32_59 = arith.constant 239 : i32
    %188 = tpu.dynamic_rotate %144 by %c239_i32_59 dim 1 : vector<16x256xf32>, i32 -> vector<16x256xf32>
    %cst_60 = arith.constant 0.000000e+00 : f32
    %189 = vector.shape_cast %28 : vector<1x256xi1> to vector<1x256xi1>
    %190 = vector.broadcast %189 : vector<1x256xi1> to vector<16x256xi1>
    %191 = vector.broadcast %cst_60 : f32 to vector<16x256xf32>
    %192 = arith.select %190, %188, %191 : vector<16x256xi1>, vector<16x256xf32>
    %193 = arith.truncf %192 : vector<16x256xf32> to vector<16x256xbf16>
    %194 = tpu.concatenate %150, %156, %162, %168, %169, %175, %181, %187, %193 in 0 : vector<16x256xbf16>, vector<16x256xbf16>, vector<16x256xbf16>, vector<16x256xbf16>, vector<16x256xbf16>, vector<16x256xbf16>, vector<16x256xbf16>, vector<16x256xbf16>, vector<16x256xbf16> -> vector<144x256xbf16>
    %cst_61 = arith.constant dense<0.000000e+00> : vector<16x256xf32>
    %195 = tpu.matmul %30, %194, %cst_61 {dimension_numbers = #tpu.dot_dimension_numbers<[1], [0], [0], [1], [0, 0, 1, 1], [], []>} : vector<16x144xbf16>, vector<144x256xbf16>, vector<16x256xf32> -> vector<16x256xf32>
    %196 = vector.extract_strided_slice %195 {offsets = [0, 0], sizes = [8, 256], strides = [1, 1]} : vector<16x256xf32> to vector<8x256xf32>
    %197 = vector.shape_cast %196 : vector<8x256xf32> to vector<1x8x256xf32>
    %cst_62 = arith.constant dense<0.000000e+00> : vector<1xf32>
    %198 = vector.multi_reduction <add>, %197, %cst_62 [1, 2] : vector<1x8x256xf32> to vector<1xf32>
    %199 = vector.shape_cast %198 : vector<1xf32> to vector<1x1x1xf32>
    %200 = vector.extract %199[0, 0, 0] : f32 from vector<1x1x1xf32>
    %cst_63 = arith.constant 2.048000e+03 : f32
    %201 = arith.divf %200, %cst_63 : f32
    %202 = vector.broadcast %201 : f32 to vector<8x256xf32>
    %203 = arith.subf %196, %202 : vector<8x256xf32>
    %204 = arith.mulf %203, %203 : vector<8x256xf32>
    %205 = vector.shape_cast %204 : vector<8x256xf32> to vector<1x8x256xf32>
    %cst_64 = arith.constant dense<0.000000e+00> : vector<1xf32>
    %206 = vector.multi_reduction <add>, %205, %cst_64 [1, 2] : vector<1x8x256xf32> to vector<1xf32>
    %207 = vector.shape_cast %206 : vector<1xf32> to vector<1x1x1xf32>
    %208 = vector.extract %207[0, 0, 0] : f32 from vector<1x1x1xf32>
    %cst_65 = arith.constant 2.047000e+03 : f32
    %209 = arith.divf %208, %cst_65 : f32
    %210 = math.sqrt %209 : f32
    %cst_66 = arith.constant 1.000000e-10 : f32
    %211 = arith.addf %210, %cst_66 : f32
    %cst_67 = arith.constant 1.000000e+00 : f32
    %212 = arith.divf %cst_67, %211 : f32
    %213 = vector.extract_strided_slice %33 {offsets = [0, 0], sizes = [8, 1], strides = [1, 1]} : vector<16x1xf32> to vector<8x1xf32>
    %214 = vector.broadcast %212 : f32 to vector<8x1xf32>
    %215 = arith.mulf %214, %213 : vector<8x1xf32>
    %216 = vector.broadcast %215 : vector<8x1xf32> to vector<8x256xf32>
    %217 = arith.mulf %203, %216 : vector<8x256xf32>
    %218 = vector.extract_strided_slice %34 {offsets = [0, 0], sizes = [8, 1], strides = [1, 1]} : vector<16x1xf32> to vector<8x1xf32>
    %219 = vector.broadcast %218 : vector<8x1xf32> to vector<8x256xf32>
    %220 = arith.addf %217, %219 : vector<8x256xf32>
    %221 = vector.extract_strided_slice %195 {offsets = [8, 0], sizes = [8, 256], strides = [1, 1]} : vector<16x256xf32> to vector<8x256xf32>
    %222 = vector.shape_cast %221 : vector<8x256xf32> to vector<1x8x256xf32>
    %cst_68 = arith.constant dense<0.000000e+00> : vector<1xf32>
    %223 = vector.multi_reduction <add>, %222, %cst_68 [1, 2] : vector<1x8x256xf32> to vector<1xf32>
    %224 = vector.shape_cast %223 : vector<1xf32> to vector<1x1x1xf32>
    %225 = vector.extract %224[0, 0, 0] : f32 from vector<1x1x1xf32>
    %cst_69 = arith.constant 2.048000e+03 : f32
    %226 = arith.divf %225, %cst_69 : f32
    %227 = vector.broadcast %226 : f32 to vector<8x256xf32>
    %228 = arith.subf %221, %227 : vector<8x256xf32>
    %229 = arith.mulf %228, %228 : vector<8x256xf32>
    %230 = vector.shape_cast %229 : vector<8x256xf32> to vector<1x8x256xf32>
    %cst_70 = arith.constant dense<0.000000e+00> : vector<1xf32>
    %231 = vector.multi_reduction <add>, %230, %cst_70 [1, 2] : vector<1x8x256xf32> to vector<1xf32>
    %232 = vector.shape_cast %231 : vector<1xf32> to vector<1x1x1xf32>
    %233 = vector.extract %232[0, 0, 0] : f32 from vector<1x1x1xf32>
    %cst_71 = arith.constant 2.047000e+03 : f32
    %234 = arith.divf %233, %cst_71 : f32
    %235 = math.sqrt %234 : f32
    %cst_72 = arith.constant 1.000000e-10 : f32
    %236 = arith.addf %235, %cst_72 : f32
    %cst_73 = arith.constant 1.000000e+00 : f32
    %237 = arith.divf %cst_73, %236 : f32
    %238 = vector.extract_strided_slice %33 {offsets = [8, 0], sizes = [8, 1], strides = [1, 1]} : vector<16x1xf32> to vector<8x1xf32>
    %239 = vector.broadcast %237 : f32 to vector<8x1xf32>
    %240 = arith.mulf %239, %238 : vector<8x1xf32>
    %241 = vector.broadcast %240 : vector<8x1xf32> to vector<8x256xf32>
    %242 = arith.mulf %228, %241 : vector<8x256xf32>
    %243 = vector.extract_strided_slice %34 {offsets = [8, 0], sizes = [8, 1], strides = [1, 1]} : vector<16x1xf32> to vector<8x1xf32>
    %244 = vector.broadcast %243 : vector<8x1xf32> to vector<8x256xf32>
    %245 = arith.addf %242, %244 : vector<8x256xf32>
    %246 = tpu.concatenate %220, %245 in 0 : vector<8x256xf32>, vector<8x256xf32> -> vector<16x256xf32>
    %c0_74 = arith.constant 0 : index
    %c0_75 = arith.constant 0 : index
    %c0_76 = arith.constant 0 : index
    %247 = vector.load %arg1[%c0_74, %c0_75, %c0_76] : memref<2x16x256xbf16, #tpu.memory_space<vmem>>, vector<1x16x256xbf16>
    %248 = vector.shape_cast %247 : vector<1x16x256xbf16> to vector<16x256xbf16>
    %249 = arith.extf %248 : vector<16x256xbf16> to vector<16x256xf32>
    %250 = arith.addf %246, %249 : vector<16x256xf32>
    %cst_77 = arith.constant 0.000000e+00 : f32
    %251 = vector.broadcast %cst_77 : f32 to vector<16x256xf32>
    %252 = arith.cmpf ogt, %250, %251 : vector<16x256xf32>
    %cst_78 = arith.constant 2.000000e-01 : f32
    %253 = vector.broadcast %cst_78 : f32 to vector<16x256xf32>
    %254 = arith.mulf %253, %250 : vector<16x256xf32>
    %255 = arith.select %252, %250, %254 : vector<16x256xi1>, vector<16x256xf32>
    %c0_79 = arith.constant 0 : index
    %c0_80 = arith.constant 0 : index
    %c0_81 = arith.constant 0 : index
    %256 = vector.load %arg8[%c0_79, %c0_80, %c0_81] : memref<2x16x256xf32, #tpu.memory_space<vmem>>, vector<1x16x256xf32>
    %257 = vector.shape_cast %256 : vector<1x16x256xf32> to vector<16x256xf32>
    %258 = vector.shape_cast %255 : vector<16x256xf32> to vector<1x16x256xf32>
    tpu.vector_store %arg8[%c0_79, %c0_80, %c0_81], %258 {strides = array<i32>} : memref<2x16x256xf32, #tpu.memory_space<vmem>>, vector<1x16x256xf32>,
    %c1 = arith.constant 1 : index
    %c0_82 = arith.constant 0 : index
    %c0_83 = arith.constant 0 : index
    %259 = vector.load %arg1[%c1, %c0_82, %c0_83] : memref<2x16x256xbf16, #tpu.memory_space<vmem>>, vector<1x16x256xbf16>
    %260 = vector.shape_cast %259 : vector<1x16x256xbf16> to vector<16x256xbf16>
    %261 = arith.extf %260 : vector<16x256xbf16> to vector<16x256xf32>
    %c17_i32_84 = arith.constant 17 : i32
    %262 = tpu.dynamic_rotate %261 by %c17_i32_84 dim 1 : vector<16x256xf32>, i32 -> vector<16x256xf32>
    %cst_85 = arith.constant 0.000000e+00 : f32
    %263 = vector.shape_cast %25 : vector<1x256xi1> to vector<1x256xi1>
    %264 = vector.broadcast %263 : vector<1x256xi1> to vector<16x256xi1>
    %265 = vector.broadcast %cst_85 : f32 to vector<16x256xf32>
    %266 = arith.select %264, %262, %265 : vector<16x256xi1>, vector<16x256xf32>
    %267 = arith.truncf %266 : vector<16x256xf32> to vector<16x256xbf16>
    %c16_i32_86 = arith.constant 16 : i32
    %268 = tpu.dynamic_rotate %261 by %c16_i32_86 dim 1 : vector<16x256xf32>, i32 -> vector<16x256xf32>
    %cst_87 = arith.constant 0.000000e+00 : f32
    %269 = vector.shape_cast %22 : vector<1x256xi1> to vector<1x256xi1>
    %270 = vector.broadcast %269 : vector<1x256xi1> to vector<16x256xi1>
    %271 = vector.broadcast %cst_87 : f32 to vector<16x256xf32>
    %272 = arith.select %270, %268, %271 : vector<16x256xi1>, vector<16x256xf32>
    %273 = arith.truncf %272 : vector<16x256xf32> to vector<16x256xbf16>
    %c15_i32_88 = arith.constant 15 : i32
    %274 = tpu.dynamic_rotate %261 by %c15_i32_88 dim 1 : vector<16x256xf32>, i32 -> vector<16x256xf32>
    %cst_89 = arith.constant 0.000000e+00 : f32
    %275 = vector.shape_cast %26 : vector<1x256xi1> to vector<1x256xi1>
    %276 = vector.broadcast %275 : vector<1x256xi1> to vector<16x256xi1>
    %277 = vector.broadcast %cst_89 : f32 to vector<16x256xf32>
    %278 = arith.select %276, %274, %277 : vector<16x256xi1>, vector<16x256xf32>
    %279 = arith.truncf %278 : vector<16x256xf32> to vector<16x256xbf16>
    %c1_i32_90 = arith.constant 1 : i32
    %280 = tpu.dynamic_rotate %261 by %c1_i32_90 dim 1 : vector<16x256xf32>, i32 -> vector<16x256xf32>
    %cst_91 = arith.constant 0.000000e+00 : f32
    %281 = vector.shape_cast %18 : vector<1x256xi1> to vector<1x256xi1>
    %282 = vector.broadcast %281 : vector<1x256xi1> to vector<16x256xi1>
    %283 = vector.broadcast %cst_91 : f32 to vector<16x256xf32>
    %284 = arith.select %282, %280, %283 : vector<16x256xi1>, vector<16x256xf32>
    %285 = arith.truncf %284 : vector<16x256xf32> to vector<16x256xbf16>
    %286 = arith.truncf %261 : vector<16x256xf32> to vector<16x256xbf16>
    %c255_i32_92 = arith.constant 255 : i32
    %287 = tpu.dynamic_rotate %261 by %c255_i32_92 dim 1 : vector<16x256xf32>, i32 -> vector<16x256xf32>
    %cst_93 = arith.constant 0.000000e+00 : f32
    %288 = vector.shape_cast %20 : vector<1x256xi1> to vector<1x256xi1>
    %289 = vector.broadcast %288 : vector<1x256xi1> to vector<16x256xi1>
    %290 = vector.broadcast %cst_93 : f32 to vector<16x256xf32>
    %291 = arith.select %289, %287, %290 : vector<16x256xi1>, vector<16x256xf32>
    %292 = arith.truncf %291 : vector<16x256xf32> to vector<16x256xbf16>
    %c241_i32_94 = arith.constant 241 : i32
    %293 = tpu.dynamic_rotate %261 by %c241_i32_94 dim 1 : vector<16x256xf32>, i32 -> vector<16x256xf32>
    %cst_95 = arith.constant 0.000000e+00 : f32
    %294 = vector.shape_cast %27 : vector<1x256xi1> to vector<1x256xi1>
    %295 = vector.broadcast %294 : vector<1x256xi1> to vector<16x256xi1>
    %296 = vector.broadcast %cst_95 : f32 to vector<16x256xf32>
    %297 = arith.select %295, %293, %296 : vector<16x256xi1>, vector<16x256xf32>
    %298 = arith.truncf %297 : vector<16x256xf32> to vector<16x256xbf16>
    %c240_i32_96 = arith.constant 240 : i32
    %299 = tpu.dynamic_rotate %261 by %c240_i32_96 dim 1 : vector<16x256xf32>, i32 -> vector<16x256xf32>
    %cst_97 = arith.constant 0.000000e+00 : f32
    %300 = vector.shape_cast %24 : vector<1x256xi1> to vector<1x256xi1>
    %301 = vector.broadcast %300 : vector<1x256xi1> to vector<16x256xi1>
    %302 = vector.broadcast %cst_97 : f32 to vector<16x256xf32>
    %303 = arith.select %301, %299, %302 : vector<16x256xi1>, vector<16x256xf32>
    %304 = arith.truncf %303 : vector<16x256xf32> to vector<16x256xbf16>
    %c239_i32_98 = arith.constant 239 : i32
    %305 = tpu.dynamic_rotate %261 by %c239_i32_98 dim 1 : vector<16x256xf32>, i32 -> vector<16x256xf32>
    %cst_99 = arith.constant 0.000000e+00 : f32
    %306 = vector.shape_cast %28 : vector<1x256xi1> to vector<1x256xi1>
    %307 = vector.broadcast %306 : vector<1x256xi1> to vector<16x256xi1>
    %308 = vector.broadcast %cst_99 : f32 to vector<16x256xf32>
    %309 = arith.select %307, %305, %308 : vector<16x256xi1>, vector<16x256xf32>
    %310 = arith.truncf %309 : vector<16x256xf32> to vector<16x256xbf16>
    %311 = tpu.concatenate %267, %273, %279, %285, %286, %292, %298, %304, %310 in 0 : vector<16x256xbf16>, vector<16x256xbf16>, vector<16x256xbf16>, vector<16x256xbf16>, vector<16x256xbf16>, vector<16x256xbf16>, vector<16x256xbf16>, vector<16x256xbf16>, vector<16x256xbf16> -> vector<144x256xbf16>
    %cst_100 = arith.constant dense<0.000000e+00> : vector<16x256xf32>
    %312 = tpu.matmul %29, %311, %cst_100 {dimension_numbers = #tpu.dot_dimension_numbers<[1], [0], [0], [1], [0, 0, 1, 1], [], []>} : vector<16x144xbf16>, vector<144x256xbf16>, vector<16x256xf32> -> vector<16x256xf32>
    %313 = vector.extract_strided_slice %312 {offsets = [0, 0], sizes = [8, 256], strides = [1, 1]} : vector<16x256xf32> to vector<8x256xf32>
    %314 = vector.shape_cast %313 : vector<8x256xf32> to vector<1x8x256xf32>
    %cst_101 = arith.constant dense<0.000000e+00> : vector<1xf32>
    %315 = vector.multi_reduction <add>, %314, %cst_101 [1, 2] : vector<1x8x256xf32> to vector<1xf32>
    %316 = vector.shape_cast %315 : vector<1xf32> to vector<1x1x1xf32>
    %317 = vector.extract %316[0, 0, 0] : f32 from vector<1x1x1xf32>
    %cst_102 = arith.constant 2.048000e+03 : f32
    %318 = arith.divf %317, %cst_102 : f32
    %319 = vector.broadcast %318 : f32 to vector<8x256xf32>
    %320 = arith.subf %313, %319 : vector<8x256xf32>
    %321 = arith.mulf %320, %320 : vector<8x256xf32>
    %322 = vector.shape_cast %321 : vector<8x256xf32> to vector<1x8x256xf32>
    %cst_103 = arith.constant dense<0.000000e+00> : vector<1xf32>
    %323 = vector.multi_reduction <add>, %322, %cst_103 [1, 2] : vector<1x8x256xf32> to vector<1xf32>
    %324 = vector.shape_cast %323 : vector<1xf32> to vector<1x1x1xf32>
    %325 = vector.extract %324[0, 0, 0] : f32 from vector<1x1x1xf32>
    %cst_104 = arith.constant 2.047000e+03 : f32
    %326 = arith.divf %325, %cst_104 : f32
    %327 = math.sqrt %326 : f32
    %cst_105 = arith.constant 1.000000e-10 : f32
    %328 = arith.addf %327, %cst_105 : f32
    %cst_106 = arith.constant 1.000000e+00 : f32
    %329 = arith.divf %cst_106, %328 : f32
    %330 = vector.extract_strided_slice %31 {offsets = [0, 0], sizes = [8, 1], strides = [1, 1]} : vector<16x1xf32> to vector<8x1xf32>
    %331 = vector.broadcast %329 : f32 to vector<8x1xf32>
    %332 = arith.mulf %331, %330 : vector<8x1xf32>
    %333 = vector.broadcast %332 : vector<8x1xf32> to vector<8x256xf32>
    %334 = arith.mulf %320, %333 : vector<8x256xf32>
    %335 = vector.extract_strided_slice %32 {offsets = [0, 0], sizes = [8, 1], strides = [1, 1]} : vector<16x1xf32> to vector<8x1xf32>
    %336 = vector.broadcast %335 : vector<8x1xf32> to vector<8x256xf32>
    %337 = arith.addf %334, %336 : vector<8x256xf32>
    %338 = vector.extract_strided_slice %312 {offsets = [8, 0], sizes = [8, 256], strides = [1, 1]} : vector<16x256xf32> to vector<8x256xf32>
    %339 = vector.shape_cast %338 : vector<8x256xf32> to vector<1x8x256xf32>
    %cst_107 = arith.constant dense<0.000000e+00> : vector<1xf32>
    %340 = vector.multi_reduction <add>, %339, %cst_107 [1, 2] : vector<1x8x256xf32> to vector<1xf32>
    %341 = vector.shape_cast %340 : vector<1xf32> to vector<1x1x1xf32>
    %342 = vector.extract %341[0, 0, 0] : f32 from vector<1x1x1xf32>
    %cst_108 = arith.constant 2.048000e+03 : f32
    %343 = arith.divf %342, %cst_108 : f32
    %344 = vector.broadcast %343 : f32 to vector<8x256xf32>
    %345 = arith.subf %338, %344 : vector<8x256xf32>
    %346 = arith.mulf %345, %345 : vector<8x256xf32>
    %347 = vector.shape_cast %346 : vector<8x256xf32> to vector<1x8x256xf32>
    %cst_109 = arith.constant dense<0.000000e+00> : vector<1xf32>
    %348 = vector.multi_reduction <add>, %347, %cst_109 [1, 2] : vector<1x8x256xf32> to vector<1xf32>
    %349 = vector.shape_cast %348 : vector<1xf32> to vector<1x1x1xf32>
    %350 = vector.extract %349[0, 0, 0] : f32 from vector<1x1x1xf32>
    %cst_110 = arith.constant 2.047000e+03 : f32
    %351 = arith.divf %350, %cst_110 : f32
    %352 = math.sqrt %351 : f32
    %cst_111 = arith.constant 1.000000e-10 : f32
    %353 = arith.addf %352, %cst_111 : f32
    %cst_112 = arith.constant 1.000000e+00 : f32
    %354 = arith.divf %cst_112, %353 : f32
    %355 = vector.extract_strided_slice %31 {offsets = [8, 0], sizes = [8, 1], strides = [1, 1]} : vector<16x1xf32> to vector<8x1xf32>
    %356 = vector.broadcast %354 : f32 to vector<8x1xf32>
    %357 = arith.mulf %356, %355 : vector<8x1xf32>
    %358 = vector.broadcast %357 : vector<8x1xf32> to vector<8x256xf32>
    %359 = arith.mulf %345, %358 : vector<8x256xf32>
    %360 = vector.extract_strided_slice %32 {offsets = [8, 0], sizes = [8, 1], strides = [1, 1]} : vector<16x1xf32> to vector<8x1xf32>
    %361 = vector.broadcast %360 : vector<8x1xf32> to vector<8x256xf32>
    %362 = arith.addf %359, %361 : vector<8x256xf32>
    %363 = tpu.concatenate %337, %362 in 0 : vector<8x256xf32>, vector<8x256xf32> -> vector<16x256xf32>
    %cst_113 = arith.constant 0.000000e+00 : f32
    %364 = vector.broadcast %cst_113 : f32 to vector<16x256xf32>
    %365 = arith.cmpf ogt, %363, %364 : vector<16x256xf32>
    %cst_114 = arith.constant 2.000000e-01 : f32
    %366 = vector.broadcast %cst_114 : f32 to vector<16x256xf32>
    %367 = arith.mulf %366, %363 : vector<16x256xf32>
    %368 = arith.select %365, %363, %367 : vector<16x256xi1>, vector<16x256xf32>
    %c17_i32_115 = arith.constant 17 : i32
    %369 = tpu.dynamic_rotate %368 by %c17_i32_115 dim 1 : vector<16x256xf32>, i32 -> vector<16x256xf32>
    %cst_116 = arith.constant 0.000000e+00 : f32
    %370 = vector.shape_cast %25 : vector<1x256xi1> to vector<1x256xi1>
    %371 = vector.broadcast %370 : vector<1x256xi1> to vector<16x256xi1>
    %372 = vector.broadcast %cst_116 : f32 to vector<16x256xf32>
    %373 = arith.select %371, %369, %372 : vector<16x256xi1>, vector<16x256xf32>
    %374 = arith.truncf %373 : vector<16x256xf32> to vector<16x256xbf16>
    %c16_i32_117 = arith.constant 16 : i32
    %375 = tpu.dynamic_rotate %368 by %c16_i32_117 dim 1 : vector<16x256xf32>, i32 -> vector<16x256xf32>
    %cst_118 = arith.constant 0.000000e+00 : f32
    %376 = vector.shape_cast %22 : vector<1x256xi1> to vector<1x256xi1>
    %377 = vector.broadcast %376 : vector<1x256xi1> to vector<16x256xi1>
    %378 = vector.broadcast %cst_118 : f32 to vector<16x256xf32>
    %379 = arith.select %377, %375, %378 : vector<16x256xi1>, vector<16x256xf32>
    %380 = arith.truncf %379 : vector<16x256xf32> to vector<16x256xbf16>
    %c15_i32_119 = arith.constant 15 : i32
    %381 = tpu.dynamic_rotate %368 by %c15_i32_119 dim 1 : vector<16x256xf32>, i32 -> vector<16x256xf32>
    %cst_120 = arith.constant 0.000000e+00 : f32
    %382 = vector.shape_cast %26 : vector<1x256xi1> to vector<1x256xi1>
    %383 = vector.broadcast %382 : vector<1x256xi1> to vector<16x256xi1>
    %384 = vector.broadcast %cst_120 : f32 to vector<16x256xf32>
    %385 = arith.select %383, %381, %384 : vector<16x256xi1>, vector<16x256xf32>
    %386 = arith.truncf %385 : vector<16x256xf32> to vector<16x256xbf16>
    %c1_i32_121 = arith.constant 1 : i32
    %387 = tpu.dynamic_rotate %368 by %c1_i32_121 dim 1 : vector<16x256xf32>, i32 -> vector<16x256xf32>
    %cst_122 = arith.constant 0.000000e+00 : f32
    %388 = vector.shape_cast %18 : vector<1x256xi1> to vector<1x256xi1>
    %389 = vector.broadcast %388 : vector<1x256xi1> to vector<16x256xi1>
    %390 = vector.broadcast %cst_122 : f32 to vector<16x256xf32>
    %391 = arith.select %389, %387, %390 : vector<16x256xi1>, vector<16x256xf32>
    %392 = arith.truncf %391 : vector<16x256xf32> to vector<16x256xbf16>
    %393 = arith.truncf %368 : vector<16x256xf32> to vector<16x256xbf16>
    %c255_i32_123 = arith.constant 255 : i32
    %394 = tpu.dynamic_rotate %368 by %c255_i32_123 dim 1 : vector<16x256xf32>, i32 -> vector<16x256xf32>
    %cst_124 = arith.constant 0.000000e+00 : f32
    %395 = vector.shape_cast %20 : vector<1x256xi1> to vector<1x256xi1>
    %396 = vector.broadcast %395 : vector<1x256xi1> to vector<16x256xi1>
    %397 = vector.broadcast %cst_124 : f32 to vector<16x256xf32>
    %398 = arith.select %396, %394, %397 : vector<16x256xi1>, vector<16x256xf32>
    %399 = arith.truncf %398 : vector<16x256xf32> to vector<16x256xbf16>
    %c241_i32_125 = arith.constant 241 : i32
    %400 = tpu.dynamic_rotate %368 by %c241_i32_125 dim 1 : vector<16x256xf32>, i32 -> vector<16x256xf32>
    %cst_126 = arith.constant 0.000000e+00 : f32
    %401 = vector.shape_cast %27 : vector<1x256xi1> to vector<1x256xi1>
    %402 = vector.broadcast %401 : vector<1x256xi1> to vector<16x256xi1>
    %403 = vector.broadcast %cst_126 : f32 to vector<16x256xf32>
    %404 = arith.select %402, %400, %403 : vector<16x256xi1>, vector<16x256xf32>
    %405 = arith.truncf %404 : vector<16x256xf32> to vector<16x256xbf16>
    %c240_i32_127 = arith.constant 240 : i32
    %406 = tpu.dynamic_rotate %368 by %c240_i32_127 dim 1 : vector<16x256xf32>, i32 -> vector<16x256xf32>
    %cst_128 = arith.constant 0.000000e+00 : f32
    %407 = vector.shape_cast %24 : vector<1x256xi1> to vector<1x256xi1>
    %408 = vector.broadcast %407 : vector<1x256xi1> to vector<16x256xi1>
    %409 = vector.broadcast %cst_128 : f32 to vector<16x256xf32>
    %410 = arith.select %408, %406, %409 : vector<16x256xi1>, vector<16x256xf32>
    %411 = arith.truncf %410 : vector<16x256xf32> to vector<16x256xbf16>
    %c239_i32_129 = arith.constant 239 : i32
    %412 = tpu.dynamic_rotate %368 by %c239_i32_129 dim 1 : vector<16x256xf32>, i32 -> vector<16x256xf32>
    %cst_130 = arith.constant 0.000000e+00 : f32
    %413 = vector.shape_cast %28 : vector<1x256xi1> to vector<1x256xi1>
    %414 = vector.broadcast %413 : vector<1x256xi1> to vector<16x256xi1>
    %415 = vector.broadcast %cst_130 : f32 to vector<16x256xf32>
    %416 = arith.select %414, %412, %415 : vector<16x256xi1>, vector<16x256xf32>
    %417 = arith.truncf %416 : vector<16x256xf32> to vector<16x256xbf16>
    %418 = tpu.concatenate %374, %380, %386, %392, %393, %399, %405, %411, %417 in 0 : vector<16x256xbf16>, vector<16x256xbf16>, vector<16x256xbf16>, vector<16x256xbf16>, vector<16x256xbf16>, vector<16x256xbf16>, vector<16x256xbf16>, vector<16x256xbf16>, vector<16x256xbf16> -> vector<144x256xbf16>
    %cst_131 = arith.constant dense<0.000000e+00> : vector<16x256xf32>
    %419 = tpu.matmul %30, %418, %cst_131 {dimension_numbers = #tpu.dot_dimension_numbers<[1], [0], [0], [1], [0, 0, 1, 1], [], []>} : vector<16x144xbf16>, vector<144x256xbf16>, vector<16x256xf32> -> vector<16x256xf32>
    %420 = vector.extract_strided_slice %419 {offsets = [0, 0], sizes = [8, 256], strides = [1, 1]} : vector<16x256xf32> to vector<8x256xf32>
    %421 = vector.shape_cast %420 : vector<8x256xf32> to vector<1x8x256xf32>
    %cst_132 = arith.constant dense<0.000000e+00> : vector<1xf32>
    %422 = vector.multi_reduction <add>, %421, %cst_132 [1, 2] : vector<1x8x256xf32> to vector<1xf32>
    %423 = vector.shape_cast %422 : vector<1xf32> to vector<1x1x1xf32>
    %424 = vector.extract %423[0, 0, 0] : f32 from vector<1x1x1xf32>
    %cst_133 = arith.constant 2.048000e+03 : f32
    %425 = arith.divf %424, %cst_133 : f32
    %426 = vector.broadcast %425 : f32 to vector<8x256xf32>
    %427 = arith.subf %420, %426 : vector<8x256xf32>
    %428 = arith.mulf %427, %427 : vector<8x256xf32>
    %429 = vector.shape_cast %428 : vector<8x256xf32> to vector<1x8x256xf32>
    %cst_134 = arith.constant dense<0.000000e+00> : vector<1xf32>
    %430 = vector.multi_reduction <add>, %429, %cst_134 [1, 2] : vector<1x8x256xf32> to vector<1xf32>
    %431 = vector.shape_cast %430 : vector<1xf32> to vector<1x1x1xf32>
    %432 = vector.extract %431[0, 0, 0] : f32 from vector<1x1x1xf32>
    %cst_135 = arith.constant 2.047000e+03 : f32
    %433 = arith.divf %432, %cst_135 : f32
    %434 = math.sqrt %433 : f32
    %cst_136 = arith.constant 1.000000e-10 : f32
    %435 = arith.addf %434, %cst_136 : f32
    %cst_137 = arith.constant 1.000000e+00 : f32
    %436 = arith.divf %cst_137, %435 : f32
    %437 = vector.extract_strided_slice %33 {offsets = [0, 0], sizes = [8, 1], strides = [1, 1]} : vector<16x1xf32> to vector<8x1xf32>
    %438 = vector.broadcast %436 : f32 to vector<8x1xf32>
    %439 = arith.mulf %438, %437 : vector<8x1xf32>
    %440 = vector.broadcast %439 : vector<8x1xf32> to vector<8x256xf32>
    %441 = arith.mulf %427, %440 : vector<8x256xf32>
    %442 = vector.extract_strided_slice %34 {offsets = [0, 0], sizes = [8, 1], strides = [1, 1]} : vector<16x1xf32> to vector<8x1xf32>
    %443 = vector.broadcast %442 : vector<8x1xf32> to vector<8x256xf32>
    %444 = arith.addf %441, %443 : vector<8x256xf32>
    %445 = vector.extract_strided_slice %419 {offsets = [8, 0], sizes = [8, 256], strides = [1, 1]} : vector<16x256xf32> to vector<8x256xf32>
    %446 = vector.shape_cast %445 : vector<8x256xf32> to vector<1x8x256xf32>
    %cst_138 = arith.constant dense<0.000000e+00> : vector<1xf32>
    %447 = vector.multi_reduction <add>, %446, %cst_138 [1, 2] : vector<1x8x256xf32> to vector<1xf32>
    %448 = vector.shape_cast %447 : vector<1xf32> to vector<1x1x1xf32>
    %449 = vector.extract %448[0, 0, 0] : f32 from vector<1x1x1xf32>
    %cst_139 = arith.constant 2.048000e+03 : f32
    %450 = arith.divf %449, %cst_139 : f32
    %451 = vector.broadcast %450 : f32 to vector<8x256xf32>
    %452 = arith.subf %445, %451 : vector<8x256xf32>
    %453 = arith.mulf %452, %452 : vector<8x256xf32>
    %454 = vector.shape_cast %453 : vector<8x256xf32> to vector<1x8x256xf32>
    %cst_140 = arith.constant dense<0.000000e+00> : vector<1xf32>
    %455 = vector.multi_reduction <add>, %454, %cst_140 [1, 2] : vector<1x8x256xf32> to vector<1xf32>
    %456 = vector.shape_cast %455 : vector<1xf32> to vector<1x1x1xf32>
    %457 = vector.extract %456[0, 0, 0] : f32 from vector<1x1x1xf32>
    %cst_141 = arith.constant 2.047000e+03 : f32
    %458 = arith.divf %457, %cst_141 : f32
    %459 = math.sqrt %458 : f32
    %cst_142 = arith.constant 1.000000e-10 : f32
    %460 = arith.addf %459, %cst_142 : f32
    %cst_143 = arith.constant 1.000000e+00 : f32
    %461 = arith.divf %cst_143, %460 : f32
    %462 = vector.extract_strided_slice %33 {offsets = [8, 0], sizes = [8, 1], strides = [1, 1]} : vector<16x1xf32> to vector<8x1xf32>
    %463 = vector.broadcast %461 : f32 to vector<8x1xf32>
    %464 = arith.mulf %463, %462 : vector<8x1xf32>
    %465 = vector.broadcast %464 : vector<8x1xf32> to vector<8x256xf32>
    %466 = arith.mulf %452, %465 : vector<8x256xf32>
    %467 = vector.extract_strided_slice %34 {offsets = [8, 0], sizes = [8, 1], strides = [1, 1]} : vector<16x1xf32> to vector<8x1xf32>
    %468 = vector.broadcast %467 : vector<8x1xf32> to vector<8x256xf32>
    %469 = arith.addf %466, %468 : vector<8x256xf32>
    %470 = tpu.concatenate %444, %469 in 0 : vector<8x256xf32>, vector<8x256xf32> -> vector<16x256xf32>
    %c1_144 = arith.constant 1 : index
    %c0_145 = arith.constant 0 : index
    %c0_146 = arith.constant 0 : index
    %471 = vector.load %arg1[%c1_144, %c0_145, %c0_146] : memref<2x16x256xbf16, #tpu.memory_space<vmem>>, vector<1x16x256xbf16>
    %472 = vector.shape_cast %471 : vector<1x16x256xbf16> to vector<16x256xbf16>
    %473 = arith.extf %472 : vector<16x256xbf16> to vector<16x256xf32>
    %474 = arith.addf %470, %473 : vector<16x256xf32>
    %cst_147 = arith.constant 0.000000e+00 : f32
    %475 = vector.broadcast %cst_147 : f32 to vector<16x256xf32>
    %476 = arith.cmpf ogt, %474, %475 : vector<16x256xf32>
    %cst_148 = arith.constant 2.000000e-01 : f32
    %477 = vector.broadcast %cst_148 : f32 to vector<16x256xf32>
    %478 = arith.mulf %477, %474 : vector<16x256xf32>
    %479 = arith.select %476, %474, %478 : vector<16x256xi1>, vector<16x256xf32>
    %c1_149 = arith.constant 1 : index
    %c0_150 = arith.constant 0 : index
    %c0_151 = arith.constant 0 : index
    %480 = vector.load %arg8[%c1_149, %c0_150, %c0_151] : memref<2x16x256xf32, #tpu.memory_space<vmem>>, vector<1x16x256xf32>
    %481 = vector.shape_cast %480 : vector<1x16x256xf32> to vector<16x256xf32>
    %482 = vector.shape_cast %479 : vector<16x256xf32> to vector<1x16x256xf32>
    tpu.vector_store %arg8[%c1_149, %c0_150, %c0_151], %482 {strides = array<i32>} : memref<2x16x256xf32, #tpu.memory_space<vmem>>, vector<1x16x256xf32>,
    return
  }
  func.func @transform_0(%arg0: i32) -> (i32, i32, i32) {
    %c0_i32 = arith.constant 0 : i32
    %c0_i32_0 = arith.constant 0 : i32
    %c0_i32_1 = arith.constant 0 : i32
    return %arg0, %c0_i32, %c0_i32_0 : i32, i32, i32
  }
  func.func @transform_1(%arg0: i32) -> (i32, i32) {
    %c0_i32 = arith.constant 0 : i32
    %c0_i32_0 = arith.constant 0 : i32
    %c0_i32_1 = arith.constant 0 : i32
    return %c0_i32, %c0_i32_0 : i32, i32
  }
  func.func @transform_2(%arg0: i32) -> (i32, i32) {
    %c0_i32 = arith.constant 0 : i32
    %c0_i32_0 = arith.constant 0 : i32
    %c0_i32_1 = arith.constant 0 : i32
    return %c0_i32, %c0_i32_0 : i32, i32
  }
  func.func @transform_3(%arg0: i32) -> (i32, i32) {
    %c0_i32 = arith.constant 0 : i32
    %c0_i32_0 = arith.constant 0 : i32
    %c0_i32_1 = arith.constant 0 : i32
    return %c0_i32, %c0_i32_0 : i32, i32
  }
  func.func @transform_4(%arg0: i32) -> (i32, i32) {
    %c0_i32 = arith.constant 0 : i32
    %c0_i32_0 = arith.constant 0 : i32
    %c0_i32_1 = arith.constant 0 : i32
    return %c0_i32, %c0_i32_0 : i32, i32
  }
  func.func @transform_5(%arg0: i32) -> (i32, i32) {
    %c0_i32 = arith.constant 0 : i32
    %c0_i32_0 = arith.constant 0 : i32
    %c0_i32_1 = arith.constant 0 : i32
    return %c0_i32, %c0_i32_0 : i32, i32
  }
  func.func @transform_6(%arg0: i32) -> (i32, i32) {
    %c0_i32 = arith.constant 0 : i32
    %c0_i32_0 = arith.constant 0 : i32
    %c0_i32_1 = arith.constant 0 : i32
    return %c0_i32, %c0_i32_0 : i32, i32
  }
  func.func @transform_7(%arg0: i32) -> (i32, i32, i32) {
    %c0_i32 = arith.constant 0 : i32
    %c0_i32_0 = arith.constant 0 : i32
    %c0_i32_1 = arith.constant 0 : i32
    return %arg0, %c0_i32, %c0_i32_0 : i32, i32, i32
  }
}

</mosaic_0001>

<bundles_post_ra>
// kernel: basic_block_forward.1
= control target key start
LH: loop header
LB: loop body
LE: loop exit
PB: predicated region body
PF: predicated region fallthrough
CT: control target
= control target key end

     0   :  { %s2087_s28 = smov 16   ;;  %s2088_s29 = smov 17   ;;  %vm291_vm0 = vcmask 130048   ;;  %v27_v11 = vlaneseq  ;;  %s3006_s0 = inlined_call_operand.vmem [shape: bf16[2,16,256], index: 0, kind: input, shape index: {}]   ;;  %s3007_s1 = inlined_call_operand.vmem [shape: bf16[16,144], index: 1, kind: input, shape index: {}]   ;;  %s3008_s2 = inlined_call_operand.vmem [shape: f32[16,1], index: 2, kind: input, shape index: {}]   ;;  %s3009_s3 = inlined_call_operand.vmem [shape: f32[16,1], index: 3, kind: input, shape index: {}]   ;;  %s3010_s4 = inlined_call_operand.vmem [shape: bf16[16,144], index: 4, kind: input, shape index: {}]   ;;  %s3011_s5 = inlined_call_operand.vmem [shape: f32[16,1], index: 5, kind: input, shape index: {}]   ;;  %s3012_s6 = inlined_call_operand.vmem [shape: f32[16,1], index: 6, kind: input, shape index: {}]   ;;  %s3013_s7 = inlined_call_operand.vmem [shape: f32[2,16,256], index: 7, kind: output, shape index: {}]  }
   0x1   :  { %v2139_v0 = vld [vmem:[%s3006_s0] sm:$0xff]  ;;  %v2144_v1 = vld [vmem:[%s3006_s0 + $0x8] sm:$0xff]  ;;  %s2089_s30 = smov 15   ;;  %s2090_s8 = smov 1  }
   0x2   :  { %v84_v2 = vunpack.c.l.bf16 %v2139_v0  ;;  %v86_v3 = vunpack.c.l.bf16 %v2144_v1  ;;  %v85_v4 = vunpack.c.h.bf16 %v2139_v0  ;;  %v87_v5 = vunpack.c.h.bf16 %v2144_v1  ;;  %s2091_s9 = smov 127   ;;  %s2092_s10 = smov 113   ;;  %v2181_v10 = vld [vmem:[%s3007_s1 + $0x4] ss:$8 sps:$4 sm:$0xff]   ;;  %v2391_v33 = vld [vmem:[%s3007_s1] ss:$8 sps:$4 sm:$0xff]  }
   0x3   :  { %v1462_v8 = vcombine.high %v2139_v0, %v2144_v1  ;;  %v1461_v9 = vcombine.low %v2139_v0, %v2144_v1  ;;  %s2093_s11 = smov 112   ;;  %s2094_s12 = smov 111   ;;  %1507 = vmatprep.mubr.msk.bf16.mxu0 %vm291_vm0, %v2181_v10  ;;  %v2185_v12 = vand.u32 127, %v27_v11 }
   0x4   :  { %v1730_v6 = vpack.i.bf16 %v86_v3, %v84_v2  ;;  %v1735_v7 = vpack.i.bf16 %v87_v5, %v85_v4 }
   0x5   :  { %v2188_v13 = vadd.s32 128, %v2185_v12  ;;  %v34_v14 = vand.u32 15, %v2185_v12  ;;  %vm58_vm2 = vcmp.ge.s32.totalorder %v2185_v12, 16  ;;  %vm3017_vm3 = vcmp.lt.s32.totalorder %v2185_v12, 16 }
   0x6   :  { %1731 = vrot.lane.b32.xlu1 %v1730_v6, %s2087_s28  ;;  %1721 = vrot.lane.b32.xlu0 %v1730_v6, %s2088_s29  ;;  %vm3021_vm5 = vcmp.lt.s32.totalorder %v2185_v12, 17  ;;  %vm3015_vm7 = vcmp.lt.s32.totalorder %v2185_v12, 15  ;;  %vm2252_vm12 = vmpackc.low %vm58_vm2, %vm58_vm2  ;;  %vm3014_vm13 = vcmp.lt.s32.totalorder %v2185_v12, 1 }
   0x7   :  { %v41_v17 = vand.u32 15, %v2188_v13  ;;  %vm2192_vm1 = vcmp.ne.s32.totalorder %v34_v14, 0  ;;  %vm2223_vm10 = vcmp.ne.s32.totalorder %v34_v14, 15 }
   0x8   :  { %vm62_vm6 = vmand %vm58_vm2, %vm2192_vm1 }
   0x9   :  { %vm2198_vm4 = vcmp.ne.s32.totalorder %v41_v17, 0  ;;  %vm2219_vm9 = vcmp.ne.s32.totalorder %v41_v17, 15  ;;  %vm2233_vm11 = vmpackc.low %vm62_vm6, %vm62_vm6  ;;  %vm3016_vm6 = vcmp.lt.s32.totalorder %v2185_v12, 127 }
   0xa   :  { %1736 = vrot.lane.b32.xlu1 %v1735_v7, %s2087_s28  ;;  %1726 = vrot.lane.b32.xlu0 %v1735_v7, %s2088_s29  ;;  %vm2215_vm8 = vmpackc.low %vm2198_vm4, %vm2198_vm4 }
   0xb   :  { %vm2266_vm14 = vmpackc.low %vm2219_vm9, %vm2219_vm9 }
   0xc   :  { %vm64_vm15 = vmand %vm58_vm2, %vm2223_vm10 }
   0xd   :  { %vm2286_vm2 = vmpackc.low %vm64_vm15, %vm64_vm15 }
   0xe   :  { %1746 = vrot.lane.b32.xlu1 %v1735_v7, %s2089_s30  ;;  %1741 = vrot.lane.b32.xlu0 %v1730_v6, %s2089_s30  ;;  %vm2296_vm15 = vmpackc.low %vm2192_vm1, %vm2192_vm1  ;;  %vm61_vm1 = vcmp.lt.s32.totalorder %v2188_v13, 240 }
  0x12   :  { %1756 = vrot.lane.b32.xlu1 %v1735_v7, %s2090_s8  ;;  %1751 = vrot.lane.b32.xlu0 %v1730_v6, %s2090_s8 }
  0x16   :  { %1766 = vrot.lane.b32.xlu1 %v1735_v7, %s2091_s9  ;;  %1761 = vrot.lane.b32.xlu0 %v1730_v6, %s2091_s9 }
  0x1a   :  { %1776 = vrot.lane.b32.xlu1 %v1735_v7, %s2092_s10  ;;  %1771 = vrot.lane.b32.xlu0 %v1730_v6, %s2092_s10 }
  0x1e   :  { %1786 = vrot.lane.b32.xlu1 %v1735_v7, %s2093_s11  ;;  %1781 = vrot.lane.b32.xlu0 %v1730_v6, %s2093_s11 }
  0x22   :  { %1796 = vrot.lane.b32.xlu1 %v1735_v7, %s2094_s12  ;;  %1791 = vrot.lane.b32.xlu0 %v1730_v6, %s2094_s12 }
  0x78   :  { %v1732_v15 = vpop.permute.xlu1 %1731  ;;  %v1722_v16 = vpop.permute.xlu0 %1721 }
  0x79   :  { %v1733_v19 = vunpack.i.l.bf16 %v1732_v15  ;;  %v1724_v20 = vunpack.i.h.bf16 %v1722_v16  ;;  %v1723_v24 = vunpack.i.l.bf16 %v1722_v16  ;;  %v1734_v28 = vunpack.i.h.bf16 %v1732_v15 }
  0x7c   :  { %v1737_v21 = vpop.permute.xlu1 %1736  ;;  %v1727_v22 = vpop.permute.xlu0 %1726 }
  0x7d   :  { %v1738_v25 = vunpack.i.l.bf16 %v1737_v21  ;;  %v1729_v26 = vunpack.i.h.bf16 %v1727_v22  ;;  %v1728_v27 = vunpack.i.l.bf16 %v1727_v22  ;;  %v1739_v29 = vunpack.i.h.bf16 %v1737_v21 }
  0x7f   :  { %v97_v30 = vsel %vm3021_vm5, %v1723_v24, %v1728_v27  ;;  %v98_v31 = vsel %vm3021_vm5, %v1724_v20, %v1729_v26  ;;  %v122_v35 = vsel %vm3017_vm3, %v1738_v25, %v1733_v19  ;;  %v99_v37 = vsel %vm3021_vm5, %v1728_v27, %v1723_v24 }
  0x80   :  { %v1466_v36 = vpack.c.bf16 %v98_v31, %v97_v30  ;;  %v100_v38 = vsel %vm3021_vm5, %v1729_v26, %v1724_v20  ;;  %v1747_v40 = vpop.permute.xlu1 %1746  ;;  %v1742_v41 = vpop.permute.xlu0 %1741  ;;  %v123_v46 = vsel %vm3017_vm3, %v1739_v29, %v1734_v28  ;;  %v120_v48 = vsel %vm3017_vm3, %v1733_v19, %v1738_v25 }
  0x81   :  { %v1469_v42 = vpack.c.bf16 %v100_v38, %v99_v37  ;;  %v1749_v43 = vunpack.i.h.bf16 %v1747_v40  ;;  %v1748_v44 = vunpack.i.l.bf16 %v1747_v40  ;;  %v1744_v45 = vunpack.i.h.bf16 %v1742_v41 }
  0x82   :  { %1467 = vmatprep.subr.msk.bf16.mxu0 %vm2215_vm8, %v1466_v36  ;;  %v1743_v47 = vunpack.i.l.bf16 %v1742_v41  ;;  %v121_v49 = vsel %vm3017_vm3, %v1734_v28, %v1739_v29  ;;  %v1472_v59 = vpack.c.bf16 %v123_v46, %v122_v35  ;;  %vm2332_vm3 = vmpackc.low %vm2223_vm10, %vm2223_vm10  ;;  %vm3020_vm10 = vcmp.lt.s32.totalorder %v2185_v12, 111  ;;  %v2086_v28 = vld [vmem:[%s3010_s4] ss:$8 sps:$4 sm:$0xff]  }
  0x83   :  { %1470 = vmatpush1.bf16.msk.msra.mxu0 %vm2233_vm11, %v1469_v42  ;;  %v144_v50 = vsel %vm3015_vm7, %v1744_v45, %v1749_v43  ;;  %v133_v51 = vpack.c.bf16 %v121_v49, %v120_v48  ;;  %v146_v53 = vsel %vm3015_vm7, %v1749_v43, %v1744_v45 }
  0x84   :  { %v143_v54 = vsel %vm3015_vm7, %v1743_v47, %v1748_v44  ;;  %v145_v55 = vsel %vm3015_vm7, %v1748_v44, %v1743_v47  ;;  %v1757_v56 = vpop.permute.xlu1 %1756  ;;  %v1752_v57 = vpop.permute.xlu0 %1751  ;;  %vm3019_vm7 = vcmp.lt.s32.totalorder %v2185_v12, 112 }
  0x85   :  { %v1475_v60 = vpack.c.bf16 %v144_v50, %v143_v54  ;;  %297 = vmatprep.subr.bf16.mxu0 %v133_v51  ;;  %v1759_v61 = vunpack.i.h.bf16 %v1757_v56  ;;  %v1758_v62 = vunpack.i.l.bf16 %v1757_v56  ;;  %v1754_v63 = vunpack.i.h.bf16 %v1752_v57 }
  0x86   :  { %v1753_v6 = vunpack.i.l.bf16 %v1752_v57  ;;  %v1478_v7 = vpack.c.bf16 %v146_v53, %v145_v55 }
  0x87   :  { %1473 = vmatpush1.bf16.msk.msra.mxu0 %vm2252_vm12, %v1472_v59  ;;  %v167_v11 = vsel %vm3014_vm13, %v1754_v63, %v1759_v61  ;;  %v169_v14 = vsel %vm3014_vm13, %v1759_v61, %v1754_v63 }
  0x88   :  { %v166_v15 = vsel %vm3014_vm13, %v1753_v6, %v1758_v62  ;;  %v168_v16 = vsel %vm3014_vm13, %v1758_v62, %v1753_v6  ;;  %1476 = vmatprep.subr.msk.bf16.mxu0 %vm2266_vm14, %v1475_v60  ;;  %v1767_v19 = vpop.permute.xlu1 %1766  ;;  %v1762_v20 = vpop.permute.xlu0 %1761  ;;  %vm3018_vm13 = vcmp.lt.s32.totalorder %v2185_v12, 113 }
  0x89   :  { %v1481_v21 = vpack.c.bf16 %v167_v11, %v166_v15  ;;  %v1769_v22 = vunpack.i.h.bf16 %v1767_v19  ;;  %v1768_v24 = vunpack.i.l.bf16 %v1767_v19  ;;  %v1764_v25 = vunpack.i.h.bf16 %v1762_v20 }
  0x8a   :  { %v1763_v26 = vunpack.i.l.bf16 %v1762_v20  ;;  %v1484_v27 = vpack.c.bf16 %v169_v14, %v168_v16 }
  0x8b   :  { %1479 = vmatpush1.bf16.msk.msra.mxu0 %vm2286_vm2, %v1478_v7  ;;  %v192_v31 = vsel %vm3016_vm6, %v1769_v22, %v1764_v25  ;;  %v190_v40 = vsel %vm3016_vm6, %v1764_v25, %v1769_v22 }
  0x8c   :  { %1482 = vmatprep.subr.msk.bf16.mxu0 %vm2215_vm8, %v1481_v21  ;;  %v1777_v29 = vpop.permute.xlu1 %1776  ;;  %v1772_v30 = vpop.permute.xlu0 %1771  ;;  %v191_v35 = vsel %vm3016_vm6, %v1768_v24, %v1763_v26  ;;  %v189_v41 = vsel %vm3016_vm6, %v1763_v26, %v1768_v24  ;;  %vm67_vm6 = vmand %vm61_vm1, %vm2198_vm4 }
  0x8d   :  { %v1779_v36 = vunpack.i.h.bf16 %v1777_v29  ;;  %v1778_v37 = vunpack.i.l.bf16 %v1777_v29  ;;  %v1774_v18 = vunpack.i.h.bf16 %v1772_v30  ;;  %v1773_v38 = vunpack.i.l.bf16 %v1772_v30  ;;  %vm2346_vm4 = vmpackc.low %vm67_vm6, %vm67_vm6 }
  0x8e   :  { %v1487_v42 = vpack.c.bf16 %v192_v31, %v191_v35  ;;  %vm2366_vm6 = vmpackc.low %vm61_vm1, %vm61_vm1 }
  0x8f   :  { %1485 = vmatpush1.bf16.msk.msra.mxu0 %vm2296_vm15, %v1484_v27  ;;  %v215_v45 = vsel %vm3018_vm13, %v1779_v36, %v1774_v18  ;;  %v214_v46 = vsel %vm3018_vm13, %v1778_v37, %v1773_v38  ;;  %v213_v53 = vsel %vm3018_vm13, %v1774_v18, %v1779_v36  ;;  %v212_v23 = vsel %vm3018_vm13, %v1773_v38, %v1778_v37  ;;  %vm69_vm13 = vmand %vm61_vm1, %vm2219_vm9 }
  0x90   :  { %303 = vmatprep.subr.bf16.mxu0 %v1462_v8  ;;  %v1787_v43 = vpop.permute.xlu1 %1786  ;;  %v1782_v44 = vpop.permute.xlu0 %1781  ;;  %v1490_v8 = vpack.c.bf16 %v190_v40, %v189_v41  ;;  %v1493_v54 = vpack.c.bf16 %v215_v45, %v214_v46  ;;  %v1496_v63 = vpack.c.bf16 %v213_v53, %v212_v23 }
  0x91   :  { %v1789_v47 = vunpack.i.h.bf16 %v1787_v43  ;;  %v1788_v48 = vunpack.i.l.bf16 %v1787_v43  ;;  %v1784_v49 = vunpack.i.h.bf16 %v1782_v44  ;;  %v1783_v50 = vunpack.i.l.bf16 %v1782_v44 }
  0x93   :  { %304 = vmatpush1.bf16.msra.mxu0 %v1461_v9  ;;  %v238_v9 = vsel %vm3019_vm7, %v1789_v47, %v1784_v49  ;;  %v237_v56 = vsel %vm3019_vm7, %v1788_v48, %v1783_v50  ;;  %v235_v7 = vsel %vm3019_vm7, %v1783_v50, %v1788_v48  ;;  %v236_v11 = vsel %vm3019_vm7, %v1784_v49, %v1789_v47  ;;  %vm2382_vm7 = vmpackc.low %vm69_vm13, %vm69_vm13 }
  0x94   :  { %1488 = vmatprep.subr.msk.bf16.mxu0 %vm2266_vm14, %v1487_v42  ;;  %v1797_v55 = vpop.permute.xlu1 %1796  ;;  %v1792_v34 = vpop.permute.xlu0 %1791  ;;  %v1499_v6 = vpack.c.bf16 %v238_v9, %v237_v56  ;;  %v247_v19 = vpack.c.bf16 %v236_v11, %v235_v7  ;;  %v2095_v9 = vmov 0  }
  0x95   :  { %v1799_v59 = vunpack.i.h.bf16 %v1797_v55  ;;  %v1798_v60 = vunpack.i.l.bf16 %v1797_v55  ;;  %v1794_v61 = vunpack.i.h.bf16 %v1792_v34  ;;  %v1793_v62 = vunpack.i.l.bf16 %v1792_v34  ;;  %1800 = vset.pattern.permute.xlu1 %v2095_v9  ;;  %1801 = vset.pattern.permute.xlu0 %v2095_v9 }
  0x97   :  { %1491 = vmatpush1.bf16.msk.msra.mxu0 %vm2332_vm3, %v1490_v8  ;;  %v261_v14 = vsel %vm3020_vm10, %v1799_v59, %v1794_v61  ;;  %v260_v15 = vsel %vm3020_vm10, %v1798_v60, %v1793_v62  ;;  %v259_v20 = vsel %vm3020_vm10, %v1794_v61, %v1799_v59  ;;  %v258_v21 = vsel %vm3020_vm10, %v1793_v62, %v1798_v60 }
  0x98   :  { %1494 = vmatprep.subr.msk.bf16.mxu0 %vm2346_vm4, %v1493_v54  ;;  %v1502_v22 = vpack.c.bf16 %v261_v14, %v260_v15  ;;  %v1505_v13 = vpack.c.bf16 %v259_v20, %v258_v21  ;;  %v74_v20 = vld [vmem:[%s3008_s2] sm:$0xff] }
  0x9b   :  { %1497 = vmatpush1.bf16.msk.msra.mxu0 %vm2296_vm15, %v1496_v63 }
  0x9c   :  { %1500 = vmatprep.subr.msk.bf16.mxu0 %vm2366_vm6, %v1499_v6 }
  0x9f   :  { %310 = vmatpush1.bf16.msra.mxu0 %v247_v19 }
  0xa0   :  { %1503 = vmatprep.subr.msk.bf16.mxu0 %vm2382_vm7, %v1502_v22 }
  0xa3   :  { %1506 = vmatpush1.bf16.msk.msra.mxu0 %vm2332_vm3, %v1505_v13 }
  0xa6   :  { %328 = vmatmul.mubr.bf16.vlgmr.msra.gmra.mrb[0].mxu0 %v2391_v33 }
  0xa7   :  { %1599 = vmatprep.mubr.msk.bf16.mxu0 %vm291_vm0, %v2181_v10 }
 0x179   :  { %v329_v25 = vpop.f32.mrb[0].mxu0 }
 0x17a   :  { %v331_v26 = vpop.f32.mrb[1].mxu0 }
 0x17b   :  { %v2398_v27 = vpop.f32.mrb[2].mxu0  ;;  %v338_v29 = vadd.f32 %v331_v26, %v329_v25 }
 0x17c   :  { %v2400_v30 = vpop.f32.mrb[3].mxu0 }
 0x17d   :  { %339 = vadd.xlane.f32.xlu0 %v338_v29  ;;  %v398_v31 = vadd.f32 %v2400_v30, %v2398_v27  ;;  %v76_v29 = vld [vmem:[%s3009_s3] sm:$0xff] }
 0x181   :  { %399 = vadd.xlane.f32.xlu0 %v398_v31 }
 0x20a   :  { %v340_v35 = vpop.xlane.xlu0 %339 }
 0x20b   :  { %v341_v36 = vrot.slane %v340_v35, 4 }
 0x20d   :  { %v342_v37 = vadd.f32 %v341_v36, %v340_v35 }
 0x20e   :  { %v400_v61 = vpop.xlane.xlu0 %399 }
 0x20f   :  { %v343_v18 = vrot.slane %v342_v37, 2  ;;  %v401_v62 = vrot.slane %v400_v61, 4 }
 0x211   :  { %v344_v38 = vadd.f32 %v343_v18, %v342_v37  ;;  %v402_v63 = vadd.f32 %v401_v62, %v400_v61 }
 0x213   :  { %v345_v40 = vrot.slane %v344_v38, 1  ;;  %v403_v6 = vrot.slane %v402_v63, 2 }
 0x215   :  { %v346_v41 = vadd.f32 %v345_v40, %v344_v38  ;;  %v404_v11 = vadd.f32 %v403_v6, %v402_v63 }
 0x217   :  { %1647 = vpush %v346_v41  ;;  %v405_v14 = vrot.slane %v404_v11, 1 }
 0x219   :  { %v406_v19 = vadd.f32 %v405_v14, %v404_v11 }
 0x248   :  { %s1648_s1 = spop %1647 }
 0x249   :  { %s350_s17 = smul.f32 0.00048828125, %s1648_s1 }
 0x24b   :  { %v351_v10 = vstv %s350_s17 }
 0x24c   :  { %v2404_v42 = vsub.f32 %v329_v25, %v351_v10  ;;  %v2406_v43 = vsub.f32 %v331_v26, %v351_v10 }
 0x24e   :  { %v354_v44 = vmul.f32 %v2404_v42, %v2404_v42  ;;  %v355_v45 = vmul.f32 %v2406_v43, %v2406_v43 }
 0x250   :  { %v356_v46 = vadd.f32 %v355_v45, %v354_v44 }
 0x252   :  { %357 = vadd.xlane.f32.xlu1 %v356_v46 }
 0x2df   :  { %v358_v47 = vpop.xlane.xlu1 %357 }
 0x2e0   :  { %v359_v48 = vrot.slane %v358_v47, 4 }
 0x2e2   :  { %v360_v49 = vadd.f32 %v359_v48, %v358_v47 }
 0x2e4   :  { %v361_v50 = vrot.slane %v360_v49, 2 }
 0x2e6   :  { %v362_v8 = vadd.f32 %v361_v50, %v360_v49 }
 0x2e8   :  { %v363_v53 = vrot.slane %v362_v8, 1 }
 0x2ea   :  { %v364_v23 = vadd.f32 %v363_v53, %v362_v8  ;;  %v75_v53 = vld [vmem:[%s3008_s2 + $0x8] sm:$0xff] }
 0x2ec   :  { %1649 = vpush %v364_v23 }
 0x31d   :  { %s1650_s18 = spop %1649 }
 0x31e   :  { %s368_s19 = smul.f32 0.0004885198, %s1650_s18 }
 0x320   :  { %v369_v54 = vstv %s368_s19 }
 0x321   :  { %2052 = vrsqrt.f32 %v369_v54  ;;  %vm372_vm9 = vcmp.eq.f32.partialorder %v369_v54, inf  ;;  %v375_v56 = vand.u32 2147483648, %v369_v54  ;;  %vm374_vm13 = vcmp.eq.f32.partialorder %v369_v54, 0.0 }
 0x32b   :  { %v2053_v55 = vpop.eup %2052 }
 0x32c   :  { %v371_v34 = vmul.f32 %v2053_v55, %v369_v54 }
 0x32e   :  { %v373_v59 = vsel %vm372_vm9, %v369_v54, %v371_v34 }
 0x32f   :  { %v376_v60 = vsel %vm374_vm13, %v375_v56, %v373_v59 }
 0x330   :  { %1651 = vpush %v376_v60 }
 0x361   :  { %s1652_s20 = spop %1651 }
 0x362   :  { %s378_s21 = sadd.f32 1e-10, %s1652_s20 }
 0x364   :  { %v379_v7 = vstv %s378_s21 }
 0x365   :  { %2054 = vrcp.f32 %v379_v7 }
 0x36f   :  { %v2055_v15 = vpop.eup %2054 }
 0x370   :  { %1653 = vpush %v2055_v15 }
 0x371   :  { %1655 = vpush %v406_v19 }
 0x3a1   :  { %s1654_s24 = spop %1653 }
 0x3a2   :  { %v382_v21 = vstv %s1654_s24  ;;  %s1656_s25 = spop %1655 }
 0x3a3   :  { %v383_v22 = vmul.f32 %v382_v21, %v74_v20  ;;  %s410_s26 = smul.f32 0.00048828125, %s1656_s25 }
 0x3a5   :  { %v411_v13 = vstv %s410_s26  ;;  %386 = vperm.xlu1 %1800, %v383_v22  }
 0x3a6   :  { %v412_v25 = vsub.f32 %v2398_v27, %v411_v13  ;;  %v413_v26 = vsub.f32 %v2400_v30, %v411_v13  ;;  %v77_v27 = vld [vmem:[%s3009_s3 + $0x8] sm:$0xff] }
 0x3a8   :  { %v414_v31 = vmul.f32 %v412_v25, %v412_v25  ;;  %v415_v35 = vmul.f32 %v413_v26, %v413_v26 }
 0x3a9   :  { %393 = vperm.xlu1 %1800, %v76_v29  }
 0x3aa   :  { %v416_v36 = vadd.f32 %v415_v35, %v414_v31  ;;  %v2470_v31 = vld [vmem:[%s3010_s4 + $0x4] ss:$8 sps:$4 sm:$0xff]  }
 0x3ab   :  { %1552 = vmatprep.mubr.msk.bf16.mxu1 %vm291_vm0, %v2470_v31 }
 0x3ac   :  { %417 = vadd.xlane.f32.xlu0 %v416_v36 }
 0x3ad   :  { %453 = vperm.xlu1 %1800, %v77_v27  }
 0x424   :  { %v387_v9 = vpop.permute.xlu1 %386 }
 0x425   :  { %v389_v34 = vmul.f32 %v387_v9, %v2404_v42  ;;  %v390_v60 = vmul.f32 %v387_v9, %v2406_v43 }
 0x428   :  { %v2426_v55 = vpop.permute.xlu1 %393 }
 0x429   :  { %v396_v56 = vadd.f32 %v2426_v55, %v389_v34  ;;  %v397_v6 = vadd.f32 %v2426_v55, %v390_v60 }
 0x42b   :  { %v462_v7 = vmul.f32 0.2, %v396_v56  ;;  %vm458_vm13 = vcmp.gt.f32.partialorder %v396_v56, 0.0  ;;  %v463_v19 = vmul.f32 0.2, %v397_v6  ;;  %vm459_vm10 = vcmp.gt.f32.partialorder %v397_v6, 0.0 }
 0x42c   :  { %v2431_v63 = vpop.permute.xlu1 %453 }
 0x42d   :  { %v2436_v20 = vsel %vm458_vm13, %v396_v56, %v462_v7  ;;  %v2446_v13 = vsel %vm459_vm10, %v397_v6, %v463_v19  ;;  %vm3050_vm10 = vcmp.lt.s32.totalorder %v2185_v12, 16 }
 0x42e   :  { %vm3051_vm13 = vmmov %vm3050_vm10 }
 0x439   :  { %v418_v37 = vpop.xlane.xlu0 %417 }
 0x43a   :  { %v419_v18 = vrot.slane %v418_v37, 4 }
 0x43c   :  { %v420_v38 = vadd.f32 %v419_v18, %v418_v37 }
 0x43e   :  { %v421_v40 = vrot.slane %v420_v38, 2 }
 0x440   :  { %v422_v41 = vadd.f32 %v421_v40, %v420_v38 }
 0x442   :  { %v423_v10 = vrot.slane %v422_v41, 1 }
 0x444   :  { %v424_v44 = vadd.f32 %v423_v10, %v422_v41 }
 0x446   :  { %1657 = vpush %v424_v44 }
 0x477   :  { %s1658_s16 = spop %1657 }
 0x478   :  { %s428_s1 = smul.f32 0.0004885198, %s1658_s16 }
 0x47a   :  { %v429_v30 = vstv %s428_s1 }
 0x47b   :  { %2056 = vrsqrt.f32 %v429_v30  ;;  %vm432_vm1 = vcmp.eq.f32.partialorder %v429_v30, inf  ;;  %v435_v47 = vand.u32 2147483648, %v429_v30  ;;  %vm434_vm9 = vcmp.eq.f32.partialorder %v429_v30, 0.0 }
 0x485   :  { %v2057_v45 = vpop.eup %2056 }
 0x486   :  { %v431_v46 = vmul.f32 %v2057_v45, %v429_v30 }
 0x488   :  { %v433_v48 = vsel %vm432_vm1, %v429_v30, %v431_v46 }
 0x489   :  { %v436_v49 = vsel %vm434_vm9, %v435_v47, %v433_v48 }
 0x48a   :  { %1659 = vpush %v436_v49 }
 0x4bb   :  { %s1660_s17 = spop %1659 }
 0x4bc   :  { %s438_s18 = sadd.f32 1e-10, %s1660_s17 }
 0x4be   :  { %v439_v50 = vstv %s438_s18 }
 0x4bf   :  { %2058 = vrcp.f32 %v439_v50 }
 0x4c9   :  { %v2059_v8 = vpop.eup %2058 }
 0x4ca   :  { %1661 = vpush %v2059_v8 }
 0x4fb   :  { %s1662_s20 = spop %1661 }
 0x4fc   :  { %v442_v23 = vstv %s1662_s20 }
 0x4fd   :  { %v443_v54 = vmul.f32 %v442_v23, %v75_v53 }
 0x4ff   :  { %446 = vperm.xlu0 %1801, %v443_v54  }
 0x57e   :  { %v447_v59 = vpop.permute.xlu0 %446 }
 0x57f   :  { %v449_v61 = vmul.f32 %v447_v59, %v412_v25  ;;  %v450_v62 = vmul.f32 %v447_v59, %v413_v26 }
 0x581   :  { %v456_v11 = vadd.f32 %v2431_v63, %v449_v61  ;;  %v457_v14 = vadd.f32 %v2431_v63, %v450_v62 }
 0x583   :  { %vm460_vm1 = vcmp.gt.f32.partialorder %v456_v11, 0.0  ;;  %v464_v15 = vmul.f32 0.2, %v456_v11  ;;  %v465_v42 = vmul.f32 0.2, %v457_v14  ;;  %vm461_vm9 = vcmp.gt.f32.partialorder %v457_v14, 0.0 }
 0x585   :  { %v2438_v43 = vsel %vm460_vm1, %v456_v11, %v464_v15  ;;  %v2442_v22 = vsel %vm461_vm9, %v457_v14, %v465_v42  ;;  %vm3052_vm1 = vmmov %vm3050_vm10 }
 0x586   :  { %v1832_v21 = vpack.i.bf16 %v2438_v43, %v2436_v20  ;;  %v1807_v25 = vpack.i.bf16 %v2442_v22, %v2446_v13  ;;  %v543_v26 = vpack.c.bf16 %v2442_v22, %v2446_v13  ;;  %v542_v29 = vpack.c.bf16 %v2438_v43, %v2436_v20  ;;  %vm3053_vm9 = vmmov %vm3052_vm1 }
 0x588   :  { %1833 = vrot.lane.b32.xlu0 %v1832_v21, %s2090_s8  ;;  %1803 = vrot.lane.b32.xlu1 %v1832_v21, %s2088_s29 }
 0x58c   :  { %1843 = vrot.lane.b32.xlu0 %v1832_v21, %s2091_s9  ;;  %1808 = vrot.lane.b32.xlu1 %v1807_v25, %s2088_s29 }
 0x590   :  { %1853 = vrot.lane.b32.xlu0 %v1832_v21, %s2092_s10  ;;  %1813 = vrot.lane.b32.xlu1 %v1832_v21, %s2087_s28 }
 0x594   :  { %1863 = vrot.lane.b32.xlu0 %v1832_v21, %s2093_s11  ;;  %1818 = vrot.lane.b32.xlu1 %v1807_v25, %s2087_s28 }
 0x598   :  { %1873 = vrot.lane.b32.xlu0 %v1832_v21, %s2094_s12  ;;  %1823 = vrot.lane.b32.xlu1 %v1832_v21, %s2089_s30 }
 0x59c   :  { %1828 = vrot.lane.b32.xlu1 %v1807_v25, %s2089_s30 }
 0x5a0   :  { %1838 = vrot.lane.b32.xlu1 %v1807_v25, %s2090_s8 }
 0x5a4   :  { %1848 = vrot.lane.b32.xlu1 %v1807_v25, %s2091_s9 }
 0x5a8   :  { %1858 = vrot.lane.b32.xlu1 %v1807_v25, %s2092_s10 }
 0x5ac   :  { %1868 = vrot.lane.b32.xlu1 %v1807_v25, %s2093_s11 }
 0x5b0   :  { %1878 = vrot.lane.b32.xlu1 %v1807_v25, %s2094_s12 }
 0x5fa   :  { %v1804_v35 = vpop.permute.xlu1 %1803  ;;  %v1834_v48 = vpop.permute.xlu0 %1833 }
 0x5fb   :  { %v1806_v37 = vunpack.i.h.bf16 %v1804_v35  ;;  %v1805_v18 = vunpack.i.l.bf16 %v1804_v35 }
 0x5fe   :  { %v1809_v36 = vpop.permute.xlu1 %1808  ;;  %v1844_v61 = vpop.permute.xlu0 %1843 }
 0x5ff   :  { %v1811_v38 = vunpack.i.h.bf16 %v1809_v36  ;;  %v1810_v40 = vunpack.i.l.bf16 %v1809_v36 }
 0x601   :  { %v478_v41 = vsel %vm3021_vm5, %v1805_v18, %v1810_v40  ;;  %v479_v10 = vsel %vm3021_vm5, %v1806_v37, %v1811_v38  ;;  %v480_v44 = vsel %vm3021_vm5, %v1810_v40, %v1805_v18  ;;  %v481_v27 = vsel %vm3021_vm5, %v1811_v38, %v1806_v37 }
 0x602   :  { %v1814_v30 = vpop.permute.xlu1 %1813  ;;  %v1511_v45 = vpack.c.bf16 %v479_v10, %v478_v41  ;;  %v1514_v46 = vpack.c.bf16 %v481_v27, %v480_v44  ;;  %v1836_v37 = vunpack.i.h.bf16 %v1834_v48  ;;  %v1835_v18 = vunpack.i.l.bf16 %v1834_v48  ;;  %v1854_v38 = vpop.permute.xlu0 %1853 }
 0x603   :  { %v1816_v49 = vunpack.i.h.bf16 %v1814_v30  ;;  %v1815_v50 = vunpack.i.l.bf16 %v1814_v30  ;;  %v1846_v48 = vunpack.i.h.bf16 %v1844_v61 }
 0x604   :  { %1512 = vmatprep.subr.msk.bf16.mxu1 %vm2215_vm8, %v1511_v45 }
 0x605   :  { %1515 = vmatpush1.bf16.msk.msra.mxu1 %vm2233_vm11, %v1514_v46 }
 0x606   :  { %v1819_v47 = vpop.permute.xlu1 %1818 }
 0x607   :  { %v1821_v8 = vunpack.i.h.bf16 %v1819_v47  ;;  %v1820_v53 = vunpack.i.l.bf16 %v1819_v47 }
 0x609   :  { %v498_v23 = vsel %vm3050_vm10, %v1820_v53, %v1815_v50  ;;  %v499_v54 = vsel %vm3051_vm13, %v1821_v8, %v1816_v49  ;;  %v496_v9 = vsel %vm3052_vm1, %v1815_v50, %v1820_v53  ;;  %v497_v34 = vsel %vm3053_vm9, %v1816_v49, %v1821_v8  ;;  %v1864_v53 = vpop.permute.xlu0 %1863 }
 0x60a   :  { %v1517_v56 = vpack.c.bf16 %v499_v54, %v498_v23  ;;  %v1824_v59 = vpop.permute.xlu1 %1823  ;;  %v505_v60 = vpack.c.bf16 %v497_v34, %v496_v9  ;;  %vm3054_vm10 = vcmp.lt.s32.totalorder %v2185_v12, 15  ;;  %v1845_v49 = vunpack.i.l.bf16 %v1844_v61 }
 0x60b   :  { %v1826_v6 = vunpack.i.h.bf16 %v1824_v59  ;;  %v1825_v7 = vunpack.i.l.bf16 %v1824_v59  ;;  %vm3055_vm13 = vmmov %vm3054_vm10  ;;  %v1856_v34 = vunpack.i.h.bf16 %v1854_v38  ;;  %v1866_v22 = vunpack.i.h.bf16 %v1864_v53 }
 0x60c   :  { %630 = vmatprep.subr.bf16.mxu1 %v505_v60  ;;  %vm3056_vm1 = vmmov %vm3054_vm10 }
 0x60d   :  { %1518 = vmatpush1.bf16.msk.msra.mxu1 %vm2252_vm12, %v1517_v56  ;;  %vm3057_vm9 = vmmov %vm3056_vm1  ;;  %v1855_v56 = vunpack.i.l.bf16 %v1854_v38 }
 0x60e   :  { %v1829_v62 = vpop.permute.xlu1 %1828 }
 0x60f   :  { %v1831_v11 = vunpack.i.h.bf16 %v1829_v62  ;;  %v1830_v14 = vunpack.i.l.bf16 %v1829_v62 }
 0x611   :  { %v514_v15 = vsel %vm3054_vm10, %v1825_v7, %v1830_v14  ;;  %v515_v42 = vsel %vm3055_vm13, %v1826_v6, %v1831_v11  ;;  %v516_v19 = vsel %vm3056_vm1, %v1830_v14, %v1825_v7  ;;  %v517_v21 = vsel %vm3057_vm9, %v1831_v11, %v1826_v6  ;;  %v1874_v14 = vpop.permute.xlu0 %1873 }
 0x612   :  { %v1520_v25 = vpack.c.bf16 %v515_v42, %v514_v15  ;;  %v1523_v35 = vpack.c.bf16 %v517_v21, %v516_v19  ;;  %v1839_v36 = vpop.permute.xlu1 %1838  ;;  %vm3058_vm10 = vcmp.lt.s32.totalorder %v2185_v12, 1 }
 0x613   :  { %v1841_v40 = vunpack.i.h.bf16 %v1839_v36  ;;  %v1840_v41 = vunpack.i.l.bf16 %v1839_v36  ;;  %vm3059_vm13 = vmmov %vm3058_vm10 }
 0x614   :  { %1521 = vmatprep.subr.msk.bf16.mxu1 %vm2266_vm14, %v1520_v25  ;;  %vm3060_vm1 = vmmov %vm3058_vm10 }
 0x615   :  { %v533_v10 = vsel %vm3058_vm10, %v1836_v37, %v1841_v40  ;;  %v535_v44 = vsel %vm3059_vm13, %v1841_v40, %v1836_v37  ;;  %v532_v27 = vsel %vm3060_vm1, %v1835_v18, %v1840_v41  ;;  %vm3061_vm9 = vmmov %vm3060_vm1  ;;  %1524 = vmatpush1.bf16.msk.msra.mxu1 %vm2286_vm2, %v1523_v35  ;;  %vm3062_vm10 = vcmp.lt.s32.totalorder %v2185_v12, 127 }
 0x616   :  { %v534_v30 = vsel %vm3061_vm9, %v1840_v41, %v1835_v18  ;;  %v1526_v45 = vpack.c.bf16 %v533_v10, %v532_v27  ;;  %v1849_v47 = vpop.permute.xlu1 %1848  ;;  %vm3063_vm13 = vmmov %vm3062_vm10  ;;  %v1875_v37 = vunpack.i.l.bf16 %v1874_v14 }
 0x617   :  { %v1529_v46 = vpack.c.bf16 %v535_v44, %v534_v30  ;;  %v1851_v50 = vunpack.i.h.bf16 %v1849_v47  ;;  %v1850_v8 = vunpack.i.l.bf16 %v1849_v47  ;;  %vm3064_vm1 = vmmov %vm3062_vm10 }
 0x618   :  { %1527 = vmatprep.subr.msk.bf16.mxu1 %vm2215_vm8, %v1526_v45  ;;  %vm3065_vm9 = vmmov %vm3064_vm1 }
 0x619   :  { %v555_v23 = vsel %vm3062_vm10, %v1851_v50, %v1846_v48  ;;  %v554_v54 = vsel %vm3063_vm13, %v1850_v8, %v1845_v49  ;;  %1530 = vmatpush1.bf16.msk.msra.mxu1 %vm2296_vm15, %v1529_v46  ;;  %v553_v61 = vsel %vm3064_vm1, %v1846_v48, %v1851_v50  ;;  %v552_v62 = vsel %vm3065_vm9, %v1845_v49, %v1850_v8  ;;  %v2047_v50 = vld [vmem:[%s3010_s4] ss:$8 sps:$4 sm:$0xff]  }
 0x61a   :  { %v1859_v9 = vpop.permute.xlu1 %1858  ;;  %636 = vmatprep.subr.bf16.mxu1 %v543_v26  ;;  %v1532_v6 = vpack.c.bf16 %v555_v23, %v554_v54  ;;  %vm3066_vm10 = vcmp.lt.s32.totalorder %v2185_v12, 113  ;;  %v1865_v26 = vunpack.i.l.bf16 %v1864_v53  ;;  %v1535_v15 = vpack.c.bf16 %v553_v61, %v552_v62 }
 0x61b   :  { %v1861_v59 = vunpack.i.h.bf16 %v1859_v9  ;;  %v1860_v60 = vunpack.i.l.bf16 %v1859_v9  ;;  %vm3067_vm13 = vmmov %vm3066_vm10 }
 0x61c   :  { %vm3068_vm1 = vmmov %vm3066_vm10 }
 0x61d   :  { %v573_v7 = vsel %vm3066_vm10, %v1861_v59, %v1856_v34  ;;  %v572_v11 = vsel %vm3067_vm13, %v1860_v60, %v1855_v56  ;;  %637 = vmatpush1.bf16.msra.mxu1 %v542_v29  ;;  %v571_v21 = vsel %vm3068_vm1, %v1856_v34, %v1861_v59  ;;  %vm3069_vm9 = vmmov %vm3068_vm1  ;;  %vm3070_vm10 = vcmp.lt.s32.totalorder %v2185_v12, 112 }
 0x61e   :  { %v1869_v13 = vpop.permute.xlu1 %1868  ;;  %1533 = vmatprep.subr.msk.bf16.mxu1 %vm2266_vm14, %v1532_v6  ;;  %v570_v25 = vsel %vm3069_vm9, %v1855_v56, %v1860_v60  ;;  %v1538_v35 = vpack.c.bf16 %v573_v7, %v572_v11  ;;  %vm3071_vm13 = vmmov %vm3070_vm10  ;;  %v1876_v29 = vunpack.i.h.bf16 %v1874_v14  ;;  %v2587_v56 = vld [vmem:[%s3006_s0 + $0x10] sm:$0xff] }
 0x61f   :  { %v1871_v42 = vunpack.i.h.bf16 %v1869_v13  ;;  %v1870_v19 = vunpack.i.l.bf16 %v1869_v13  ;;  %v1541_v18 = vpack.c.bf16 %v571_v21, %v570_v25  ;;  %vm3072_vm1 = vmmov %vm3070_vm10  ;;  %v814_v59 = vunpack.c.l.bf16 %v2587_v56 }
 0x620   :  { %vm3073_vm9 = vmmov %vm3072_vm1 }
 0x621   :  { %v591_v20 = vsel %vm3070_vm10, %v1871_v42, %v1866_v22  ;;  %v590_v43 = vsel %vm3071_vm13, %v1870_v19, %v1865_v26  ;;  %1536 = vmatpush1.bf16.msk.msra.mxu1 %vm2332_vm3, %v1535_v15  ;;  %v588_v10 = vsel %vm3072_vm1, %v1865_v26, %v1870_v19  ;;  %v589_v44 = vsel %vm3073_vm9, %v1866_v22, %v1871_v42 }
 0x622   :  { %v1879_v36 = vpop.permute.xlu1 %1878  ;;  %1539 = vmatprep.subr.msk.bf16.mxu1 %vm2346_vm4, %v1538_v35  ;;  %v1544_v41 = vpack.c.bf16 %v591_v20, %v590_v43  ;;  %vm3074_vm10 = vcmp.lt.s32.totalorder %v2185_v12, 111  ;;  %v596_v45 = vpack.c.bf16 %v589_v44, %v588_v10  ;;  %v815_v35 = vunpack.c.h.bf16 %v2587_v56 }
 0x623   :  { %v1881_v38 = vunpack.i.h.bf16 %v1879_v36  ;;  %v1880_v40 = vunpack.i.l.bf16 %v1879_v36  ;;  %vm3075_vm13 = vmmov %vm3074_vm10 }
 0x624   :  { %vm3076_vm5 = vmmov %vm3074_vm10 }
 0x625   :  { %v609_v27 = vsel %vm3074_vm10, %v1881_v38, %v1876_v29  ;;  %v608_v30 = vsel %vm3075_vm13, %v1880_v40, %v1875_v37  ;;  %1542 = vmatpush1.bf16.msk.msra.mxu1 %vm2296_vm15, %v1541_v18  ;;  %v607_v46 = vsel %vm3076_vm5, %v1876_v29, %v1881_v38  ;;  %vm3077_vm1 = vmmov %vm3076_vm5  ;;  %vm3082_vm13 = vcmp.lt.s32.totalorder %v2185_v12, 16 }
 0x626   :  { %1545 = vmatprep.subr.msk.bf16.mxu1 %vm2366_vm6, %v1544_v41  ;;  %v606_v47 = vsel %vm3077_vm1, %v1875_v37, %v1880_v40  ;;  %v1547_v48 = vpack.c.bf16 %v609_v27, %v608_v30  ;;  %vm3083_vm1 = vmmov %vm3082_vm13 }
 0x627   :  { %v1550_v49 = vpack.c.bf16 %v607_v46, %v606_v47 }
 0x629   :  { %643 = vmatpush1.bf16.msra.mxu1 %v596_v45 }
 0x62a   :  { %1548 = vmatprep.subr.msk.bf16.mxu1 %vm2382_vm7, %v1547_v48 }
 0x62d   :  { %1551 = vmatpush1.bf16.msk.msra.mxu1 %vm2332_vm3, %v1550_v49 }
 0x630   :  { %661 = vmatmul.mubr.bf16.vlgmr.msra.gmra.mrb[0].mxu1 %v2047_v50 }
 0x631   :  { %1642 = vmatprep.mubr.msk.bf16.mxu1 %vm291_vm0, %v2470_v31  ;;  %v2592_v31 = vld [vmem:[%s3006_s0 + $0x18] sm:$0xff]  ;;  %vm3078_vm0 = vcmp.lt.s32.totalorder %v2185_v12, 17 }
 0x632   :  { %v816_v60 = vunpack.c.l.bf16 %v2592_v31  ;;  %v817_v20 = vunpack.c.h.bf16 %v2592_v31  ;;  %vm3079_vm5 = vmmov %vm3078_vm0 }
 0x633   :  { %vm3080_vm9 = vmmov %vm3078_vm0 }
 0x634   :  { %v1882_v61 = vpack.i.bf16 %v816_v60, %v814_v59  ;;  %v1887_v43 = vpack.i.bf16 %v817_v20, %v815_v35  ;;  %vm3081_vm10 = vmmov %vm3078_vm0 }
 0x703   :  { %v662_v8 = vpop.f32.mrb[0].mxu1 }
 0x704   :  { %v664_v53 = vpop.f32.mrb[1].mxu1 }
 0x705   :  { %v2578_v23 = vpop.f32.mrb[2].mxu1  ;;  %v671_v54 = vadd.f32 %v664_v53, %v662_v8 }
 0x706   :  { %v2580_v9 = vpop.f32.mrb[3].mxu1 }
 0x707   :  { %672 = vadd.xlane.f32.xlu0 %v671_v54  ;;  %v731_v34 = vadd.f32 %v2580_v9, %v2578_v23 }
 0x71d   :  { %1883 = vrot.lane.b32.xlu0 %v1882_v61, %s2088_s29 }
 0x721   :  { %1893 = vrot.lane.b32.xlu0 %v1882_v61, %s2087_s28 }
 0x725   :  { %1903 = vrot.lane.b32.xlu0 %v1882_v61, %s2089_s30 }
 0x729   :  { %1913 = vrot.lane.b32.xlu0 %v1882_v61, %s2090_s8 }
 0x72d   :  { %1923 = vrot.lane.b32.xlu0 %v1882_v61, %s2091_s9 }
 0x731   :  { %1933 = vrot.lane.b32.xlu0 %v1882_v61, %s2092_s10 }
 0x735   :  { %1943 = vrot.lane.b32.xlu0 %v1882_v61, %s2093_s11 }
 0x739   :  { %1953 = vrot.lane.b32.xlu0 %v1882_v61, %s2094_s12 }
 0x758   :  { %732 = vadd.xlane.f32.xlu0 %v731_v34 }
 0x794   :  { %v673_v62 = vpop.xlane.xlu0 %672 }
 0x795   :  { %v674_v6 = vrot.slane %v673_v62, 4 }
 0x797   :  { %v675_v7 = vadd.f32 %v674_v6, %v673_v62 }
 0x798   :  { %v1884_v29 = vpop.permute.xlu0 %1883 }
 0x799   :  { %v676_v11 = vrot.slane %v675_v7, 2  ;;  %v1886_v40 = vunpack.i.h.bf16 %v1884_v29  ;;  %v1885_v41 = vunpack.i.l.bf16 %v1884_v29 }
 0x79b   :  { %v677_v22 = vadd.f32 %v676_v11, %v675_v7 }
 0x79c   :  { %v1894_v36 = vpop.permute.xlu0 %1893 }
 0x79d   :  { %v678_v13 = vrot.slane %v677_v22, 1  ;;  %v1896_v46 = vunpack.i.h.bf16 %v1894_v36  ;;  %v1895_v47 = vunpack.i.l.bf16 %v1894_v36 }
 0x79f   :  { %v679_v26 = vadd.f32 %v678_v13, %v677_v22 }
 0x7a0   :  { %v1904_v37 = vpop.permute.xlu0 %1903 }
 0x7a1   :  { %1663 = vpush %v679_v26  ;;  %v1906_v22 = vunpack.i.h.bf16 %v1904_v37  ;;  %v1905_v13 = vunpack.i.l.bf16 %v1904_v37 }
 0x7a4   :  { %v1914_v48 = vpop.permute.xlu0 %1913 }
 0x7d2   :  { %s1664_s0 = spop %1663 }
 0x7d3   :  { %s683_s14 = smul.f32 0.00048828125, %s1664_s0 }
 0x7d5   :  { %v684_v14 = vstv %s683_s14 }
 0x7d6   :  { %v2608_v15 = vsub.f32 %v662_v8, %v684_v14  ;;  %v2610_v42 = vsub.f32 %v664_v53, %v684_v14 }
 0x7d8   :  { %v687_v19 = vmul.f32 %v2608_v15, %v2608_v15  ;;  %v688_v21 = vmul.f32 %v2610_v42, %v2610_v42 }
 0x7da   :  { %v689_v25 = vadd.f32 %v688_v21, %v687_v19 }
 0x7dc   :  { %690 = vadd.xlane.f32.xlu1 %v689_v25  ;;  %v1924_v25 = vpop.permute.xlu0 %1923 }
 0x7ed   :  { %1888 = vrot.lane.b32.xlu1 %v1887_v43, %s2088_s29 }
 0x7f1   :  { %1898 = vrot.lane.b32.xlu1 %v1887_v43, %s2087_s28 }
 0x7f5   :  { %1908 = vrot.lane.b32.xlu1 %v1887_v43, %s2089_s30 }
 0x7f9   :  { %1918 = vrot.lane.b32.xlu1 %v1887_v43, %s2090_s8 }
 0x7fd   :  { %1928 = vrot.lane.b32.xlu1 %v1887_v43, %s2091_s9 }
 0x801   :  { %1938 = vrot.lane.b32.xlu1 %v1887_v43, %s2092_s10 }
 0x805   :  { %1948 = vrot.lane.b32.xlu1 %v1887_v43, %s2093_s11 }
 0x809   :  { %1958 = vrot.lane.b32.xlu1 %v1887_v43, %s2094_s12 }
 0x869   :  { %v691_v18 = vpop.xlane.xlu1 %690 }
 0x86a   :  { %v692_v38 = vrot.slane %v691_v18, 4 }
 0x86c   :  { %v693_v10 = vadd.f32 %v692_v38, %v691_v18 }
 0x86d   :  { %v1889_v44 = vpop.permute.xlu1 %1888 }
 0x86e   :  { %v694_v27 = vrot.slane %v693_v10, 2  ;;  %v1891_v30 = vunpack.i.h.bf16 %v1889_v44  ;;  %v1890_v45 = vunpack.i.l.bf16 %v1889_v44 }
 0x870   :  { %v695_v49 = vadd.f32 %v694_v27, %v693_v10  ;;  %v826_v50 = vsel %vm3078_vm0, %v1885_v41, %v1890_v45  ;;  %v827_v8 = vsel %vm3079_vm5, %v1886_v40, %v1891_v30  ;;  %v828_v53 = vsel %vm3080_vm9, %v1890_v45, %v1885_v41  ;;  %vm3084_vm0 = vmmov %vm3083_vm1 }
 0x871   :  { %v829_v54 = vsel %vm3081_vm10, %v1891_v30, %v1886_v40  ;;  %v1558_v34 = vpack.c.bf16 %v827_v8, %v826_v50  ;;  %v1899_v61 = vpop.permute.xlu1 %1898  ;;  %vm3085_vm5 = vmmov %vm3084_vm0  ;;  %v1916_v40 = vunpack.i.h.bf16 %v1914_v48  ;;  %v1915_v41 = vunpack.i.l.bf16 %v1914_v48 }
 0x872   :  { %v696_v62 = vrot.slane %v695_v49, 1  ;;  %v1561_v6 = vpack.c.bf16 %v829_v54, %v828_v53  ;;  %v1901_v7 = vunpack.i.h.bf16 %v1899_v61  ;;  %v1900_v11 = vunpack.i.l.bf16 %v1899_v61  ;;  %v1934_v53 = vpop.permute.xlu0 %1933 }
 0x873   :  { %1559 = vmatprep.subr.msk.bf16.mxu0 %vm2215_vm8, %v1558_v34  ;;  %vm3086_vm9 = vcmp.lt.s32.totalorder %v2185_v12, 15  ;;  %v1926_v50 = vunpack.i.h.bf16 %v1924_v25  ;;  %v1925_v8 = vunpack.i.l.bf16 %v1924_v25 }
 0x874   :  { %v697_v26 = vadd.f32 %v696_v62, %v695_v49  ;;  %v846_v14 = vsel %vm3082_vm13, %v1900_v11, %v1895_v47  ;;  %v847_v19 = vsel %vm3083_vm1, %v1901_v7, %v1896_v46  ;;  %1562 = vmatpush1.bf16.msk.msra.mxu0 %vm2233_vm11, %v1561_v6  ;;  %v844_v21 = vsel %vm3084_vm0, %v1895_v47, %v1900_v11  ;;  %vm3087_vm10 = vmmov %vm3086_vm9 }
 0x875   :  { %v1564_v43 = vpack.c.bf16 %v847_v19, %v846_v14  ;;  %v1909_v29 = vpop.permute.xlu1 %1908  ;;  %v845_v36 = vsel %vm3085_vm5, %v1896_v46, %v1901_v7  ;;  %vm3088_vm13 = vmmov %vm3086_vm9  ;;  %vm3090_vm0 = vcmp.lt.s32.totalorder %v2185_v12, 1  ;;  %v1936_v14 = vunpack.i.h.bf16 %v1934_v53 }
 0x876   :  { %1665 = vpush %v697_v26  ;;  %v1911_v37 = vunpack.i.h.bf16 %v1909_v29  ;;  %v1910_v18 = vunpack.i.l.bf16 %v1909_v29  ;;  %v853_v38 = vpack.c.bf16 %v845_v36, %v844_v21  ;;  %vm3089_vm1 = vmmov %vm3086_vm9  ;;  %v1556_v26 = vcombine.high %v2587_v56, %v2592_v31 }
 0x877   :  { %vm3091_vm5 = vmmov %vm3090_vm0  ;;  %v1935_v19 = vunpack.i.l.bf16 %v1934_v53  ;;  %v1555_v36 = vcombine.low %v2587_v56, %v2592_v31 }
 0x878   :  { %v862_v10 = vsel %vm3086_vm9, %v1905_v13, %v1910_v18  ;;  %v863_v44 = vsel %vm3087_vm10, %v1906_v22, %v1911_v37  ;;  %v864_v27 = vsel %vm3088_vm13, %v1910_v18, %v1905_v13  ;;  %v865_v30 = vsel %vm3089_vm1, %v1911_v37, %v1906_v22  ;;  %974 = vmatprep.subr.bf16.mxu0 %v853_v38  ;;  %vm3092_vm9 = vmmov %vm3090_vm0 }
 0x879   :  { %v1567_v45 = vpack.c.bf16 %v863_v44, %v862_v10  ;;  %v1570_v46 = vpack.c.bf16 %v865_v30, %v864_v27  ;;  %1565 = vmatpush1.bf16.msk.msra.mxu0 %vm2252_vm12, %v1564_v43  ;;  %v1919_v47 = vpop.permute.xlu1 %1918  ;;  %vm3093_vm10 = vmmov %vm3090_vm0  ;;  %vm3094_vm13 = vcmp.lt.s32.totalorder %v2185_v12, 127  ;;  %v1944_v43 = vpop.permute.xlu0 %1943 }
 0x87a   :  { %v1921_v48 = vunpack.i.h.bf16 %v1919_v47  ;;  %v1920_v49 = vunpack.i.l.bf16 %v1919_v47  ;;  %vm3095_vm1 = vmmov %vm3094_vm13  ;;  %v1946_v10 = vunpack.i.h.bf16 %v1944_v43  ;;  %v1945_v44 = vunpack.i.l.bf16 %v1944_v43 }
 0x87b   :  { %1568 = vmatprep.subr.msk.bf16.mxu0 %vm2266_vm14, %v1567_v45 }
 0x87c   :  { %v880_v54 = vsel %vm3090_vm0, %v1915_v41, %v1920_v49  ;;  %v881_v34 = vsel %vm3091_vm5, %v1916_v40, %v1921_v48  ;;  %v882_v61 = vsel %vm3092_vm9, %v1920_v49, %v1915_v41  ;;  %v883_v62 = vsel %vm3093_vm10, %v1921_v48, %v1916_v40  ;;  %vm3096_vm0 = vmmov %vm3095_vm1 }
 0x87d   :  { %v1573_v6 = vpack.c.bf16 %v881_v34, %v880_v54  ;;  %v1576_v7 = vpack.c.bf16 %v883_v62, %v882_v61  ;;  %1571 = vmatpush1.bf16.msk.msra.mxu0 %vm2286_vm2, %v1570_v46  ;;  %v1929_v11 = vpop.permute.xlu1 %1928  ;;  %vm3097_vm5 = vmmov %vm3096_vm0  ;;  %vm3098_vm9 = vcmp.lt.s32.totalorder %v2185_v12, 113  ;;  %v1954_v53 = vpop.permute.xlu0 %1953 }
 0x87e   :  { %v1931_v22 = vunpack.i.h.bf16 %v1929_v11  ;;  %v1930_v13 = vunpack.i.l.bf16 %v1929_v11  ;;  %vm3099_vm10 = vmmov %vm3098_vm9  ;;  %v1956_v54 = vunpack.i.h.bf16 %v1954_v53  ;;  %v1955_v34 = vunpack.i.l.bf16 %v1954_v53 }
 0x87f   :  { %1574 = vmatprep.subr.msk.bf16.mxu0 %vm2215_vm8, %v1573_v6 }
 0x880   :  { %v900_v21 = vsel %vm3094_vm13, %v1930_v13, %v1925_v8  ;;  %v901_v25 = vsel %vm3095_vm1, %v1931_v22, %v1926_v50  ;;  %v898_v29 = vsel %vm3096_vm0, %v1925_v8, %v1930_v13  ;;  %v899_v18 = vsel %vm3097_vm5, %v1926_v50, %v1931_v22  ;;  %vm3100_vm13 = vmmov %vm3098_vm9 }
 0x881   :  { %1577 = vmatpush1.bf16.msk.msra.mxu0 %vm2296_vm15, %v1576_v7  ;;  %v1939_v37 = vpop.permute.xlu1 %1938  ;;  %v1579_v38 = vpack.c.bf16 %v901_v25, %v900_v21  ;;  %v1582_v45 = vpack.c.bf16 %v899_v18, %v898_v29  ;;  %vm3101_vm1 = vmmov %vm3098_vm9  ;;  %vm3102_vm0 = vcmp.lt.s32.totalorder %v2185_v12, 112 }
 0x882   :  { %980 = vmatprep.subr.bf16.mxu0 %v1556_v26  ;;  %v1941_v40 = vunpack.i.h.bf16 %v1939_v37  ;;  %v1940_v41 = vunpack.i.l.bf16 %v1939_v37  ;;  %vm3103_vm5 = vmmov %vm3102_vm0 }
 0x884   :  { %v918_v27 = vsel %vm3098_vm9, %v1940_v41, %v1935_v19  ;;  %v919_v30 = vsel %vm3099_vm10, %v1941_v40, %v1936_v14  ;;  %v916_v46 = vsel %vm3100_vm13, %v1935_v19, %v1940_v41  ;;  %v917_v48 = vsel %vm3101_vm1, %v1936_v14, %v1941_v40  ;;  %vm3104_vm9 = vmmov %vm3102_vm0 }
 0x885   :  { %981 = vmatpush1.bf16.msra.mxu0 %v1555_v36  ;;  %v1949_v47 = vpop.permute.xlu1 %1948  ;;  %v1585_v49 = vpack.c.bf16 %v919_v30, %v918_v27  ;;  %v1588_v6 = vpack.c.bf16 %v917_v48, %v916_v46  ;;  %vm3105_vm10 = vmmov %vm3102_vm0  ;;  %vm3106_vm13 = vcmp.lt.s32.totalorder %v2185_v12, 111  ;;  %v733_v27 = vpop.xlane.xlu0 %732 }
 0x886   :  { %1580 = vmatprep.subr.msk.bf16.mxu0 %vm2266_vm14, %v1579_v38  ;;  %v1951_v50 = vunpack.i.h.bf16 %v1949_v47  ;;  %v1950_v8 = vunpack.i.l.bf16 %v1949_v47  ;;  %vm3107_vm1 = vmmov %vm3106_vm13  ;;  %v734_v30 = vrot.slane %v733_v27, 4 }
 0x888   :  { %v936_v61 = vsel %vm3102_vm0, %v1950_v8, %v1945_v44  ;;  %v937_v62 = vsel %vm3103_vm5, %v1951_v50, %v1946_v10  ;;  %v934_v7 = vsel %vm3104_vm9, %v1945_v44, %v1950_v8  ;;  %v935_v22 = vsel %vm3105_vm10, %v1946_v10, %v1951_v50  ;;  %vm3108_vm0 = vmmov %vm3107_vm1 }
 0x889   :  { %1583 = vmatpush1.bf16.msk.msra.mxu0 %vm2332_vm3, %v1582_v45  ;;  %v1959_v11 = vpop.permute.xlu1 %1958  ;;  %v1591_v13 = vpack.c.bf16 %v937_v62, %v936_v61  ;;  %v942_v25 = vpack.c.bf16 %v935_v22, %v934_v7  ;;  %vm3109_vm5 = vmmov %vm3108_vm0  ;;  %v735_v45 = vadd.f32 %v734_v30, %v733_v27 }
 0x88a   :  { %1586 = vmatprep.subr.msk.bf16.mxu0 %vm2346_vm4, %v1585_v49  ;;  %v1961_v26 = vunpack.i.h.bf16 %v1959_v11  ;;  %v1960_v14 = vunpack.i.l.bf16 %v1959_v11 }
 0x88b   :  { %v736_v46 = vrot.slane %v735_v45, 2 }
 0x88c   :  { %v954_v19 = vsel %vm3106_vm13, %v1960_v14, %v1955_v34  ;;  %v955_v21 = vsel %vm3107_vm1, %v1961_v26, %v1956_v54  ;;  %v952_v43 = vsel %vm3108_vm0, %v1955_v34, %v1960_v14  ;;  %v953_v29 = vsel %vm3109_vm5, %v1956_v54, %v1961_v26 }
 0x88d   :  { %1589 = vmatpush1.bf16.msk.msra.mxu0 %vm2296_vm15, %v1588_v6  ;;  %v1594_v36 = vpack.c.bf16 %v955_v21, %v954_v19  ;;  %v1597_v37 = vpack.c.bf16 %v953_v29, %v952_v43 }
 0x88e   :  { %1592 = vmatprep.subr.msk.bf16.mxu0 %vm2366_vm6, %v1591_v13 }
 0x891   :  { %987 = vmatpush1.bf16.msra.mxu0 %v942_v25 }
 0x892   :  { %1595 = vmatprep.subr.msk.bf16.mxu0 %vm2382_vm7, %v1594_v36 }
 0x895   :  { %1598 = vmatpush1.bf16.msk.msra.mxu0 %vm2332_vm3, %v1597_v37 }
 0x898   :  { %1005 = vmatmul.mubr.bf16.vlgmr.msra.gmra.mrb[4].mxu0 %v2391_v33  ;;  %v737_v33 = vadd.f32 %v736_v46, %v735_v45 }
 0x89a   :  { %v738_v48 = vrot.slane %v737_v33, 1 }
 0x89c   :  { %v739_v50 = vadd.f32 %v738_v48, %v737_v33 }
 0x8a7   :  { %s1666_s15 = spop %1665 }
 0x8a8   :  { %s701_s16 = smul.f32 0.0004885198, %s1666_s15 }
 0x8aa   :  { %v702_v18 = vstv %s701_s16 }
 0x8ab   :  { %2060 = vrsqrt.f32 %v702_v18  ;;  %vm705_vm9 = vcmp.eq.f32.partialorder %v702_v18, inf  ;;  %v708_v41 = vand.u32 2147483648, %v702_v18  ;;  %vm707_vm10 = vcmp.eq.f32.partialorder %v702_v18, 0.0 }
 0x8b5   :  { %v2061_v38 = vpop.eup %2060 }
 0x8b6   :  { %v704_v40 = vmul.f32 %v2061_v38, %v702_v18 }
 0x8b8   :  { %v706_v10 = vsel %vm705_vm9, %v702_v18, %v704_v40 }
 0x8b9   :  { %v709_v44 = vsel %vm707_vm10, %v708_v41, %v706_v10 }
 0x8ba   :  { %1667 = vpush %v709_v44 }
 0x8eb   :  { %s1668_s1 = spop %1667 }
 0x8ec   :  { %s711_s17 = sadd.f32 1e-10, %s1668_s1 }
 0x8ee   :  { %v712_v47 = vstv %s711_s17 }
 0x8ef   :  { %2062 = vrcp.f32 %v712_v47 }
 0x8f9   :  { %v2063_v49 = vpop.eup %2062 }
 0x8fa   :  { %1669 = vpush %v2063_v49 }
 0x8fb   :  { %1671 = vpush %v739_v50 }
 0x92b   :  { %s2727_s18 = spop %1669 }
 0x92c   :  { %s1672_s3 = spop %1671 }
 0x92d   :  { %s743_s19 = smul.f32 0.00048828125, %s1672_s3 }
 0x92f   :  { %v744_v8 = vstv %s743_s19 }
 0x930   :  { %v2730_v53 = vsub.f32 %v2578_v23, %v744_v8  ;;  %v2733_v54 = vsub.f32 %v2580_v9, %v744_v8 }
 0x932   :  { %v747_v34 = vmul.f32 %v2730_v53, %v2730_v53  ;;  %v748_v61 = vmul.f32 %v2733_v54, %v2733_v54 }
 0x934   :  { %v749_v62 = vadd.f32 %v748_v61, %v747_v34 }
 0x936   :  { %750 = vadd.xlane.f32.xlu1 %v749_v62 }
 0x96b   :  { %v1006_v6 = vpop.f32.mrb[4].mxu0 }
 0x96c   :  { %v1008_v7 = vpop.f32.mrb[5].mxu0 }
 0x96d   :  { %v2739_v11 = vpop.f32.mrb[6].mxu0  ;;  %v1015_v22 = vadd.f32 %v1008_v7, %v1006_v6 }
 0x96e   :  { %v2741_v13 = vpop.f32.mrb[7].mxu0 }
 0x96f   :  { %v1070_v23 = vadd.f32 %v2741_v13, %v2739_v11  ;;  %1016 = vadd.xlane.f32.xlu0 %v1015_v22 }
 0x971   :  { %1071 = vadd.xlane.f32.xlu1 %v1070_v23 }
 0x9c3   :  { %v751_v9 = vpop.xlane.xlu1 %750 }
 0x9c4   :  { %v752_v26 = vrot.slane %v751_v9, 4 }
 0x9c6   :  { %v753_v14 = vadd.f32 %v752_v26, %v751_v9 }
 0x9c8   :  { %v754_v19 = vrot.slane %v753_v14, 2 }
 0x9ca   :  { %v755_v21 = vadd.f32 %v754_v19, %v753_v14 }
 0x9cc   :  { %v756_v25 = vrot.slane %v755_v21, 1 }
 0x9ce   :  { %v757_v43 = vadd.f32 %v756_v25, %v755_v21 }
 0x9d0   :  { %1673 = vpush %v757_v43 }
 0x9fc   :  { %v1017_v41 = vpop.xlane.xlu0 %1016 }
 0x9fd   :  { %v1018_v10 = vrot.slane %v1017_v41, 4 }
 0x9ff   :  { %v1019_v44 = vadd.f32 %v1018_v10, %v1017_v41 }
 0xa01   :  { %s1674_s20 = spop %1673  ;;  %v1020_v27 = vrot.slane %v1019_v44, 2 }
 0xa02   :  { %s761_s21 = smul.f32 0.0004885198, %s1674_s20 }
 0xa03   :  { %v1021_v45 = vadd.f32 %v1020_v27, %v1019_v44 }
 0xa04   :  { %v762_v29 = vstv %s761_s21 }
 0xa05   :  { %2064 = vrsqrt.f32 %v762_v29  ;;  %vm765_vm13 = vcmp.eq.f32.partialorder %v762_v29, inf  ;;  %v768_v18 = vand.u32 2147483648, %v762_v29  ;;  %vm767_vm1 = vcmp.eq.f32.partialorder %v762_v29, 0.0 }
 0xa06   :  { %v1022_v46 = vrot.slane %v1021_v45, 1 }
 0xa08   :  { %v1023_v33 = vadd.f32 %v1022_v46, %v1021_v45  ;;  %v2084_v45 = vld [vmem:[%s3008_s2] sm:$0xff] }
 0xa0f   :  { %v2065_v36 = vpop.eup %2064 }
 0xa10   :  { %v764_v37 = vmul.f32 %v2065_v36, %v762_v29  ;;  %v1072_v36 = vpop.xlane.xlu1 %1071 }
 0xa12   :  { %v766_v38 = vsel %vm765_vm13, %v762_v29, %v764_v37  ;;  %v1073_v37 = vrot.slane %v1072_v36, 4 }
 0xa13   :  { %v769_v40 = vsel %vm767_vm1, %v768_v18, %v766_v38 }
 0xa14   :  { %1675 = vpush %v769_v40  ;;  %v1074_v18 = vadd.f32 %v1073_v37, %v1072_v36  ;;  %v2085_v37 = vld [vmem:[%s3008_s2 + $0x8] sm:$0xff] }
 0xa16   :  { %v1075_v38 = vrot.slane %v1074_v18, 2 }
 0xa18   :  { %v1076_v41 = vadd.f32 %v1075_v38, %v1074_v18 }
 0xa1a   :  { %v1077_v10 = vrot.slane %v1076_v41, 1 }
 0xa1c   :  { %v1078_v27 = vadd.f32 %v1077_v10, %v1076_v41 }
 0xa45   :  { %s1676_s22 = spop %1675 }
 0xa46   :  { %s771_s23 = sadd.f32 1e-10, %s1676_s22 }
 0xa48   :  { %v772_v30 = vstv %s771_s23 }
 0xa49   :  { %2066 = vrcp.f32 %v772_v30 }
 0xa53   :  { %v2067_v47 = vpop.eup %2066 }
 0xa54   :  { %1677 = vpush %v2067_v47 }
 0xa55   :  { %1679 = vpush %v1023_v33 }
 0xa85   :  { %s2745_s24 = spop %1677 }
 0xa86   :  { %s1680_s25 = spop %1679 }
 0xa87   :  { %s1027_s26 = smul.f32 0.00048828125, %s1680_s25 }
 0xa89   :  { %v1028_v48 = vstv %s1027_s26 }
 0xa8a   :  { %v2747_v49 = vsub.f32 %v1006_v6, %v1028_v48  ;;  %v2749_v50 = vsub.f32 %v1008_v7, %v1028_v48 }
 0xa8c   :  { %v1031_v8 = vmul.f32 %v2747_v49, %v2747_v49  ;;  %v1032_v34 = vmul.f32 %v2749_v50, %v2749_v50 }
 0xa8e   :  { %v1033_v61 = vadd.f32 %v1032_v34, %v1031_v8 }
 0xa90   :  { %1034 = vadd.xlane.f32.xlu0 %v1033_v61 }
 0xb1d   :  { %v1035_v62 = vpop.xlane.xlu0 %1034 }
 0xb1e   :  { %v1036_v22 = vrot.slane %v1035_v62, 4 }
 0xb20   :  { %v1037_v23 = vadd.f32 %v1036_v22, %v1035_v62 }
 0xb22   :  { %v1038_v9 = vrot.slane %v1037_v23, 2 }
 0xb24   :  { %v1039_v26 = vadd.f32 %v1038_v9, %v1037_v23 }
 0xb26   :  { %v1040_v14 = vrot.slane %v1039_v26, 1 }
 0xb28   :  { %v1041_v19 = vadd.f32 %v1040_v14, %v1039_v26 }
 0xb2a   :  { %1681 = vpush %v1041_v19 }
 0xb5b   :  { %s1682_s27 = spop %1681 }
 0xb5c   :  { %s1045_s13 = smul.f32 0.0004885198, %s1682_s27 }
 0xb5e   :  { %v1046_v6 = vstv %s1045_s13 }
 0xb5f   :  { %2068 = vrsqrt.f32 %v1046_v6  ;;  %vm1049_vm0 = vcmp.eq.f32.partialorder %v1046_v6, inf  ;;  %v1052_v25 = vand.u32 2147483648, %v1046_v6  ;;  %vm1051_vm5 = vcmp.eq.f32.partialorder %v1046_v6, 0.0 }
 0xb69   :  { %v2069_v7 = vpop.eup %2068 }
 0xb6a   :  { %v1048_v21 = vmul.f32 %v2069_v7, %v1046_v6 }
 0xb6c   :  { %v1050_v43 = vsel %vm1049_vm0, %v1046_v6, %v1048_v21 }
 0xb6d   :  { %v1053_v29 = vsel %vm1051_vm5, %v1052_v25, %v1050_v43 }
 0xb6e   :  { %1683 = vpush %v1053_v29 }
 0xb9f   :  { %s1684_s0 = spop %1683 }
 0xba0   :  { %s1055_s14 = sadd.f32 1e-10, %s1684_s0 }
 0xba2   :  { %v1056_v40 = vstv %s1055_s14 }
 0xba3   :  { %2070 = vrcp.f32 %v1056_v40 }
 0xbad   :  { %v2071_v44 = vpop.eup %2070 }
 0xbae   :  { %1685 = vpush %v2071_v44 }
 0xbaf   :  { %1687 = vpush %v1078_v27 }
 0xbdf   :  { %s1686_s15 = spop %1685 }
 0xbe0   :  { %v1059_v30 = vstv %s1686_s15  ;;  %s1688_s16 = spop %1687 }
 0xbe1   :  { %v1060_v46 = vmul.f32 %v2084_v45, %v1059_v30  ;;  %s1082_s3 = smul.f32 0.00048828125, %s1688_s16 }
 0xbe3   :  { %v1083_v47 = vstv %s1082_s3  ;;  %1063 = vperm.xlu1 %1800, %v1060_v46  }
 0xbe4   :  { %v1084_v33 = vsub.f32 %v2739_v11, %v1083_v47  ;;  %v1085_v48 = vsub.f32 %v2741_v13, %v1083_v47 }
 0xbe6   :  { %v1086_v8 = vmul.f32 %v1084_v33, %v1084_v33  ;;  %v1087_v34 = vmul.f32 %v1085_v48, %v1085_v48 }
 0xbe8   :  { %v1088_v61 = vadd.f32 %v1087_v34, %v1086_v8 }
 0xbea   :  { %1089 = vadd.xlane.f32.xlu0 %v1088_v61 }
 0xc62   :  { %v1064_v38 = vpop.permute.xlu1 %1063 }
 0xc63   :  { %v1066_v40 = vmul.f32 %v1064_v38, %v2747_v49  ;;  %v1067_v41 = vmul.f32 %v1064_v38, %v2749_v50 }
 0xc65   :  { %v1068_v10 = vadd.f32 %v1066_v40, %v2426_v55  ;;  %v1069_v45 = vadd.f32 %v1067_v41, %v2426_v55 }
 0xc67   :  { %v1129_v46 = vmul.f32 0.2, %v1068_v10  ;;  %vm1125_vm13 = vcmp.gt.f32.partialorder %v1068_v10, 0.0  ;;  %v1130_v49 = vmul.f32 0.2, %v1069_v45  ;;  %vm1126_vm5 = vcmp.gt.f32.partialorder %v1069_v45, 0.0 }
 0xc77   :  { %v1090_v62 = vpop.xlane.xlu0 %1089 }
 0xc78   :  { %v1091_v22 = vrot.slane %v1090_v62, 4 }
 0xc7a   :  { %v1092_v23 = vadd.f32 %v1091_v22, %v1090_v62  ;;  %v2769_v62 = vsel %vm1125_vm13, %v1068_v10, %v1129_v46 }
 0xc7c   :  { %v1093_v9 = vrot.slane %v1092_v23, 2 }
 0xc7e   :  { %v1094_v26 = vadd.f32 %v1093_v9, %v1092_v23 }
 0xc80   :  { %v1095_v14 = vrot.slane %v1094_v26, 1 }
 0xc82   :  { %v1096_v19 = vadd.f32 %v1095_v14, %v1094_v26 }
 0xc84   :  { %1689 = vpush %v1096_v19 }
 0xcb5   :  { %s1690_s19 = spop %1689 }
 0xcb6   :  { %s1100_s20 = smul.f32 0.0004885198, %s1690_s19 }
 0xcb8   :  { %v1101_v6 = vstv %s1100_s20 }
 0xcb9   :  { %2072 = vrsqrt.f32 %v1101_v6  ;;  %vm1104_vm9 = vcmp.eq.f32.partialorder %v1101_v6, inf  ;;  %v1107_v13 = vand.u32 2147483648, %v1101_v6  ;;  %vm1106_vm10 = vcmp.eq.f32.partialorder %v1101_v6, 0.0 }
 0xcc3   :  { %v2073_v7 = vpop.eup %2072 }
 0xcc4   :  { %v1103_v11 = vmul.f32 %v2073_v7, %v1101_v6 }
 0xcc6   :  { %v1105_v21 = vsel %vm1104_vm9, %v1101_v6, %v1103_v11  ;;  %vm3110_vm9 = vcmp.lt.s32.totalorder %v2185_v12, 17 }
 0xcc7   :  { %v1108_v25 = vsel %vm1106_vm10, %v1107_v13, %v1105_v21  ;;  %vm3111_vm10 = vmmov %vm3110_vm9 }
 0xcc8   :  { %1691 = vpush %v1108_v25  ;;  %vm3112_vm13 = vmmov %vm3110_vm9 }
 0xcf9   :  { %s1692_s21 = spop %1691 }
 0xcfa   :  { %s1110_s22 = sadd.f32 1e-10, %s1692_s21 }
 0xcfc   :  { %v1111_v43 = vstv %s1110_s22 }
 0xcfd   :  { %2074 = vrcp.f32 %v1111_v43 }
 0xd07   :  { %v2075_v29 = vpop.eup %2074 }
 0xd08   :  { %1693 = vpush %v2075_v29 }
 0xd39   :  { %s1694_s23 = spop %1693 }
 0xd3a   :  { %v1114_v36 = vstv %s1694_s23 }
 0xd3b   :  { %v1115_v18 = vmul.f32 %v2085_v37, %v1114_v36 }
 0xd3d   :  { %1118 = vperm.xlu0 %1801, %v1115_v18  }
 0xdbc   :  { %v1119_v44 = vpop.permute.xlu0 %1118 }
 0xdbd   :  { %v1121_v27 = vmul.f32 %v1119_v44, %v1084_v33  ;;  %v1122_v30 = vmul.f32 %v1119_v44, %v1085_v48 }
 0xdbf   :  { %v1123_v47 = vadd.f32 %v1121_v27, %v2431_v63  ;;  %v1124_v8 = vadd.f32 %v1122_v30, %v2431_v63  ;;  %v2779_v63 = vsel %vm1126_vm5, %v1069_v45, %v1130_v49 }
 0xdc1   :  { %vm1127_vm1 = vcmp.gt.f32.partialorder %v1123_v47, 0.0  ;;  %v1131_v34 = vmul.f32 0.2, %v1123_v47  ;;  %v1132_v61 = vmul.f32 0.2, %v1124_v8  ;;  %vm1128_vm0 = vcmp.gt.f32.partialorder %v1124_v8, 0.0 }
 0xdc3   :  { %v2771_v50 = vsel %vm1127_vm1, %v1123_v47, %v1131_v34  ;;  %v2775_v55 = vsel %vm1128_vm0, %v1124_v8, %v1132_v61  ;;  %vm3113_vm1 = vmmov %vm3110_vm9  ;;  %vm3114_vm0 = vcmp.lt.s32.totalorder %v2185_v12, 16 }
 0xdc4   :  { %v1972_v33 = vpack.i.bf16 %v2771_v50, %v2769_v62  ;;  %v1967_v48 = vpack.i.bf16 %v2775_v55, %v2779_v63  ;;  %v1210_v22 = vpack.c.bf16 %v2775_v55, %v2779_v63  ;;  %v1209_v23 = vpack.c.bf16 %v2771_v50, %v2769_v62  ;;  %vm3115_vm5 = vmmov %vm3114_vm0 }
 0xdc6   :  { %1973 = vrot.lane.b32.xlu0 %v1972_v33, %s2087_s28  ;;  %1963 = vrot.lane.b32.xlu1 %v1972_v33, %s2088_s29 }
 0xdca   :  { %1983 = vrot.lane.b32.xlu0 %v1972_v33, %s2089_s30  ;;  %1968 = vrot.lane.b32.xlu1 %v1967_v48, %s2088_s29 }
 0xdce   :  { %1993 = vrot.lane.b32.xlu0 %v1972_v33, %s2090_s8  ;;  %1978 = vrot.lane.b32.xlu1 %v1967_v48, %s2087_s28 }
 0xdd2   :  { %2003 = vrot.lane.b32.xlu0 %v1972_v33, %s2091_s9  ;;  %1988 = vrot.lane.b32.xlu1 %v1967_v48, %s2089_s30 }
 0xdd6   :  { %2013 = vrot.lane.b32.xlu0 %v1972_v33, %s2092_s10  ;;  %1998 = vrot.lane.b32.xlu1 %v1967_v48, %s2090_s8 }
 0xdda   :  { %2023 = vrot.lane.b32.xlu0 %v1972_v33, %s2093_s11  ;;  %2008 = vrot.lane.b32.xlu1 %v1967_v48, %s2091_s9 }
 0xdde   :  { %2033 = vrot.lane.b32.xlu0 %v1972_v33, %s2094_s12  ;;  %2018 = vrot.lane.b32.xlu1 %v1967_v48, %s2092_s10 }
 0xde2   :  { %2028 = vrot.lane.b32.xlu1 %v1967_v48, %s2093_s11 }
 0xde6   :  { %2038 = vrot.lane.b32.xlu1 %v1967_v48, %s2094_s12 }
 0xe38   :  { %v1974_v9 = vpop.permute.xlu0 %1973  ;;  %v1964_v26 = vpop.permute.xlu1 %1963 }
 0xe39   :  { %v1966_v6 = vunpack.i.h.bf16 %v1964_v26  ;;  %v1965_v7 = vunpack.i.l.bf16 %v1964_v26  ;;  %v1976_v40 = vunpack.i.h.bf16 %v1974_v9  ;;  %v1975_v41 = vunpack.i.l.bf16 %v1974_v9 }
 0xe3c   :  { %v1984_v14 = vpop.permute.xlu0 %1983  ;;  %v1969_v19 = vpop.permute.xlu1 %1968 }
 0xe3d   :  { %v1971_v11 = vunpack.i.h.bf16 %v1969_v19  ;;  %v1970_v13 = vunpack.i.l.bf16 %v1969_v19  ;;  %v1986_v49 = vunpack.i.h.bf16 %v1984_v14  ;;  %v1985_v33 = vunpack.i.l.bf16 %v1984_v14 }
 0xe3f   :  { %v1145_v21 = vsel %vm3110_vm9, %v1965_v7, %v1970_v13  ;;  %v1146_v25 = vsel %vm3111_vm10, %v1966_v6, %v1971_v11  ;;  %v1147_v43 = vsel %vm3112_vm13, %v1970_v13, %v1965_v7  ;;  %v1148_v29 = vsel %vm3113_vm1, %v1971_v11, %v1966_v6  ;;  %vm3116_vm9 = vmmov %vm3114_vm0 }
 0xe40   :  { %v1601_v36 = vpack.c.bf16 %v1146_v25, %v1145_v21  ;;  %v1604_v37 = vpack.c.bf16 %v1148_v29, %v1147_v43  ;;  %v1994_v18 = vpop.permute.xlu0 %1993  ;;  %v1979_v38 = vpop.permute.xlu1 %1978  ;;  %vm3117_vm10 = vmmov %vm3114_vm0  ;;  %vm3118_vm13 = vcmp.lt.s32.totalorder %v2185_v12, 15 }
 0xe41   :  { %v1981_v10 = vunpack.i.h.bf16 %v1979_v38  ;;  %v1980_v44 = vunpack.i.l.bf16 %v1979_v38  ;;  %v1996_v13 = vunpack.i.h.bf16 %v1994_v18  ;;  %v1995_v21 = vunpack.i.l.bf16 %v1994_v18 }
 0xe42   :  { %1602 = vmatprep.subr.msk.bf16.mxu1 %vm2215_vm8, %v1601_v36 }
 0xe43   :  { %v1166_v27 = vsel %vm3114_vm0, %v1981_v10, %v1976_v40  ;;  %v1165_v30 = vsel %vm3115_vm5, %v1980_v44, %v1975_v41  ;;  %1605 = vmatpush1.bf16.msk.msra.mxu1 %vm2233_vm11, %v1604_v37  ;;  %v1163_v45 = vsel %vm3116_vm9, %v1975_v41, %v1980_v44  ;;  %v1164_v46 = vsel %vm3117_vm10, %v1976_v40, %v1981_v10  ;;  %vm3119_vm11 = vmmov %vm3118_vm13 }
 0xe44   :  { %v1607_v47 = vpack.c.bf16 %v1166_v27, %v1165_v30  ;;  %v2004_v8 = vpop.permute.xlu0 %2003  ;;  %v1989_v34 = vpop.permute.xlu1 %1988  ;;  %v1172_v61 = vpack.c.bf16 %v1164_v46, %v1163_v45  ;;  %vm3120_vm1 = vmmov %vm3119_vm11  ;;  %vm3122_vm5 = vcmp.lt.s32.totalorder %v2185_v12, 1 }
 0xe45   :  { %v1991_v48 = vunpack.i.h.bf16 %v1989_v34  ;;  %v1990_v9 = vunpack.i.l.bf16 %v1989_v34  ;;  %vm3121_vm0 = vmmov %vm3120_vm1  ;;  %v2006_v10 = vunpack.i.h.bf16 %v2004_v8  ;;  %v2005_v44 = vunpack.i.l.bf16 %v2004_v8 }
 0xe46   :  { %1285 = vmatprep.subr.bf16.mxu1 %v1172_v61  ;;  %vm3123_vm9 = vmmov %vm3122_vm5 }
 0xe47   :  { %v1182_v26 = vsel %vm3118_vm13, %v1986_v49, %v1991_v48  ;;  %v1184_v39 = vsel %vm3119_vm11, %v1991_v48, %v1986_v49  ;;  %v1181_v19 = vsel %vm3120_vm1, %v1985_v33, %v1990_v9  ;;  %v1183_v6 = vsel %vm3121_vm0, %v1990_v9, %v1985_v33  ;;  %1608 = vmatpush1.bf16.msk.msra.mxu1 %vm2252_vm12, %v1607_v47  ;;  %vm3124_vm10 = vmmov %vm3122_vm5 }
 0xe48   :  { %v1610_v7 = vpack.c.bf16 %v1182_v26, %v1181_v19  ;;  %v1613_v14 = vpack.c.bf16 %v1184_v39, %v1183_v6  ;;  %v1999_v11 = vpop.permute.xlu1 %1998  ;;  %v2014_v25 = vpop.permute.xlu0 %2013  ;;  %vm3125_vm12 = vmmov %vm3122_vm5  ;;  %vm3126_vm13 = vcmp.lt.s32.totalorder %v2185_v12, 127  ;;  %vm3130_vm1 = vcmp.lt.s32.totalorder %v2185_v12, 113 }
 0xe49   :  { %v2001_v43 = vunpack.i.h.bf16 %v1999_v11  ;;  %v2000_v29 = vunpack.i.l.bf16 %v1999_v11  ;;  %vm3127_vm11 = vmmov %vm3126_vm13  ;;  %v2016_v8 = vunpack.i.h.bf16 %v2014_v25  ;;  %v2015_v34 = vunpack.i.l.bf16 %v2014_v25 }
 0xe4a   :  { %1611 = vmatprep.subr.msk.bf16.mxu1 %vm2266_vm14, %v1610_v7  ;;  %vm3131_vm0 = vmmov %vm3130_vm1 }
 0xe4b   :  { %v1200_v36 = vsel %vm3122_vm5, %v1996_v13, %v2001_v43  ;;  %v1202_v37 = vsel %vm3123_vm9, %v2001_v43, %v1996_v13  ;;  %v1199_v52 = vsel %vm3124_vm10, %v1995_v21, %v2000_v29  ;;  %v1201_v38 = vsel %vm3125_vm12, %v2000_v29, %v1995_v21  ;;  %1614 = vmatpush1.bf16.msk.msra.mxu1 %vm2286_vm2, %v1613_v14  ;;  %vm3132_vm5 = vmmov %vm3131_vm0 }
 0xe4c   :  { %v1616_v18 = vpack.c.bf16 %v1200_v36, %v1199_v52  ;;  %v1619_v40 = vpack.c.bf16 %v1202_v37, %v1201_v38  ;;  %v2009_v41 = vpop.permute.xlu1 %2008  ;;  %v2024_v45 = vpop.permute.xlu0 %2023  ;;  %vm3133_vm9 = vmmov %vm3131_vm0  ;;  %vm3134_vm10 = vcmp.lt.s32.totalorder %v2185_v12, 112 }
 0xe4d   :  { %v2011_v27 = vunpack.i.h.bf16 %v2009_v41  ;;  %v2010_v30 = vunpack.i.l.bf16 %v2009_v41  ;;  %v2026_v55 = vunpack.i.h.bf16 %v2024_v45  ;;  %vm3135_vm12 = vmmov %vm3134_vm10 }
 0xe4e   :  { %1617 = vmatprep.subr.msk.bf16.mxu1 %vm2215_vm8, %v1616_v18  ;;  %vm3128_vm8 = vmmov %vm3127_vm11 }
 0xe4f   :  { %v1222_v46 = vsel %vm3126_vm13, %v2011_v27, %v2006_v10  ;;  %v1221_v47 = vsel %vm3127_vm11, %v2010_v30, %v2005_v44  ;;  %1620 = vmatpush1.bf16.msk.msra.mxu1 %vm2296_vm15, %v1619_v40  ;;  %v1220_v49 = vsel %vm3128_vm8, %v2006_v10, %v2011_v27  ;;  %vm3129_vm2 = vmmov %vm3128_vm8  ;;  %vm3138_vm11 = vcmp.lt.s32.totalorder %v2185_v12, 111 }
 0xe50   :  { %v2019_v17 = vpop.permute.xlu1 %2018  ;;  %1291 = vmatprep.subr.bf16.mxu1 %v1210_v22  ;;  %v1219_v33 = vsel %vm3129_vm2, %v2005_v44, %v2010_v30  ;;  %v1622_v48 = vpack.c.bf16 %v1222_v46, %v1221_v47  ;;  %v2025_v22 = vunpack.i.l.bf16 %v2024_v45  ;;  %v2034_v19 = vpop.permute.xlu0 %2033  ;;  %vm3137_vm13 = vmmov %vm3134_vm10 }
 0xe51   :  { %v2021_v61 = vunpack.i.h.bf16 %v2019_v17  ;;  %v2020_v32 = vunpack.i.l.bf16 %v2019_v17  ;;  %v1625_v39 = vpack.c.bf16 %v1220_v49, %v1219_v33  ;;  %v2036_v58 = vunpack.i.h.bf16 %v2034_v19  ;;  %vm3139_vm8 = vmmov %vm3138_vm11 }
 0xe52   :  { %v2035_v21 = vunpack.i.l.bf16 %v2034_v19  ;;  %v775_v19 = vstv %s2745_s24 }
 0xe53   :  { %v1240_v9 = vsel %vm3130_vm1, %v2021_v61, %v2016_v8  ;;  %v1239_v26 = vsel %vm3131_vm0, %v2020_v32, %v2015_v34  ;;  %1292 = vmatpush1.bf16.msra.mxu1 %v1209_v23  ;;  %v1238_v14 = vsel %vm3132_vm5, %v2016_v8, %v2021_v61  ;;  %v1237_v11 = vsel %vm3133_vm9, %v2015_v34, %v2020_v32 }
 0xe54   :  { %v2029_v63 = vpop.permute.xlu1 %2028  ;;  %1623 = vmatprep.subr.msk.bf16.mxu1 %vm2266_vm14, %v1622_v48  ;;  %v1628_v13 = vpack.c.bf16 %v1240_v9, %v1239_v26  ;;  %v1631_v25 = vpack.c.bf16 %v1238_v14, %v1237_v11  ;;  %vm3136_vm14 = vmmov %vm3134_vm10 }
 0xe55   :  { %v2031_v6 = vunpack.i.h.bf16 %v2029_v63  ;;  %v2030_v7 = vunpack.i.l.bf16 %v2029_v63  ;;  %v715_v63 = vstv %s2727_s18 }
 0xe57   :  { %v1258_v62 = vsel %vm3134_vm10, %v2031_v6, %v2026_v55  ;;  %v1257_v50 = vsel %vm3135_vm12, %v2030_v7, %v2025_v22  ;;  %1626 = vmatpush1.bf16.msk.msra.mxu1 %vm2332_vm3, %v1625_v39  ;;  %v1256_v36 = vsel %vm3136_vm14, %v2026_v55, %v2031_v6  ;;  %v1255_v37 = vsel %vm3137_vm13, %v2025_v22, %v2030_v7  ;;  %v2919_v55 = vld [vmem:[%s3011_s5] sm:$0xff]  ;;  %v2926_v39 = vld [vmem:[%s3011_s5 + $0x8] sm:$0xff] }
 0xe58   :  { %v2039_v23 = vpop.permute.xlu1 %2038  ;;  %1629 = vmatprep.subr.msk.bf16.mxu1 %vm2346_vm4, %v1628_v13  ;;  %v1634_v52 = vpack.c.bf16 %v1258_v62, %v1257_v50  ;;  %v1263_v57 = vpack.c.bf16 %v1256_v36, %v1255_v37  ;;  %vm3140_vm4 = vmmov %vm3139_vm8  ;;  %v716_v22 = vmul.f32 %v715_v63, %v2919_v55  ;;  %v776_v6 = vmul.f32 %v775_v19, %v2926_v39  ;;  %v81_v7 = vld [vmem:[%s3012_s6 + $0x8] sm:$0xff] }
 0xe59   :  { %v2041_v43 = vunpack.i.h.bf16 %v2039_v23  ;;  %v2040_v29 = vunpack.i.l.bf16 %v2039_v23  ;;  %vm3141_vm2 = vmmov %vm3140_vm4 }
 0xe5b   :  { %v1276_v38 = vsel %vm3138_vm11, %v2041_v43, %v2036_v58  ;;  %v1275_v18 = vsel %vm3139_vm8, %v2040_v29, %v2035_v21  ;;  %1632 = vmatpush1.bf16.msk.msra.mxu1 %vm2296_vm15, %v1631_v25  ;;  %v1274_v40 = vsel %vm3140_vm4, %v2036_v58, %v2041_v43  ;;  %v1273_v41 = vsel %vm3141_vm2, %v2035_v21, %v2040_v29 }
 0xe5c   :  { %1635 = vmatprep.subr.msk.bf16.mxu1 %vm2366_vm6, %v1634_v52  ;;  %v1637_v10 = vpack.c.bf16 %v1276_v38, %v1275_v18  ;;  %v1640_v44 = vpack.c.bf16 %v1274_v40, %v1273_v41 }
 0xe5f   :  { %1298 = vmatpush1.bf16.msra.mxu1 %v1263_v57 }
 0xe60   :  { %1638 = vmatprep.subr.msk.bf16.mxu1 %vm2382_vm7, %v1637_v10 }
 0xe63   :  { %1641 = vmatpush1.bf16.msk.msra.mxu1 %vm2332_vm3, %v1640_v44 }
 0xe66   :  { %1316 = vmatmul.mubr.bf16.vlgmr.msra.gmra.mrb[4].mxu1 %v2086_v28 }
 0xf39   :  { %v1317_v16 = vpop.f32.mrb[4].mxu1 }
 0xf3a   :  { %v1319_v27 = vpop.f32.mrb[5].mxu1 }
 0xf3b   :  { %v2902_v30 = vpop.f32.mrb[6].mxu1  ;;  %v1326_v12 = vadd.f32 %v1319_v27, %v1317_v16 }
 0xf3c   :  { %v2904_v45 = vpop.f32.mrb[7].mxu1 }
 0xf3d   :  { %v1381_v24 = vadd.f32 %v2904_v45, %v2902_v30  ;;  %1327 = vadd.xlane.f32.xlu0 %v1326_v12 }
 0xf41   :  { %1382 = vadd.xlane.f32.xlu0 %v1381_v24 }
 0xfca   :  { %v1328_v46 = vpop.xlane.xlu0 %1327 }
 0xfcb   :  { %v1329_v51 = vrot.slane %v1328_v46, 4 }
 0xfcd   :  { %v1330_v47 = vadd.f32 %v1329_v51, %v1328_v46 }
 0xfce   :  { %v1383_v28 = vpop.xlane.xlu0 %1382 }
 0xfcf   :  { %v1331_v17 = vrot.slane %v1330_v47, 2 }
 0xfd1   :  { %v1332_v8 = vadd.f32 %v1331_v17, %v1330_v47 }
 0xfd3   :  { %v1333_v34 = vrot.slane %v1332_v8, 1 }
 0xfd5   :  { %v1334_v61 = vadd.f32 %v1333_v34, %v1332_v8 }
 0xfd7   :  { %1695 = vpush %v1334_v61 }
0x1008   :  { %s1696_s4 = spop %1695 }
0x1009   :  { %s1338_s29 = smul.f32 0.00048828125, %s1696_s4 }
0x100b   :  { %v1339_v32 = vstv %s1338_s29 }
0x100c   :  { %v2908_v49 = vsub.f32 %v1317_v16, %v1339_v32  ;;  %v2910_v33 = vsub.f32 %v1319_v27, %v1339_v32  ;;  %v1384_v16 = vrot.slane %v1383_v28, 4 }
0x100e   :  { %v1342_v48 = vmul.f32 %v2908_v49, %v2908_v49  ;;  %v1343_v9 = vmul.f32 %v2910_v33, %v2910_v33  ;;  %v1385_v27 = vadd.f32 %v1384_v16, %v1383_v28 }
0x1010   :  { %v1344_v26 = vadd.f32 %v1343_v9, %v1342_v48  ;;  %v1386_v12 = vrot.slane %v1385_v27, 2 }
0x1012   :  { %1345 = vadd.xlane.f32.xlu1 %v1344_v26  ;;  %v1387_v46 = vadd.f32 %v1386_v12, %v1385_v27  ;;  %v80_v26 = vld [vmem:[%s3012_s6] sm:$0xff] }
0x1014   :  { %v1388_v51 = vrot.slane %v1387_v46, 1 }
0x1016   :  { %v1389_v17 = vadd.f32 %v1388_v51, %v1387_v46 }
0x1023   :  { %719 = vperm.xlu1 %1800, %v716_v22  }
0x1027   :  { %779 = vperm.xlu1 %1800, %v776_v6  }
0x102b   :  { %786 = vperm.xlu1 %1800, %v81_v7  }
0x109f   :  { %v1346_v14 = vpop.xlane.xlu1 %1345 }
0x10a0   :  { %v1347_v11 = vrot.slane %v1346_v14, 4 }
0x10a2   :  { %v1348_v13 = vadd.f32 %v1347_v11, %v1346_v14 }
0x10a3   :  { %v2933_v62 = vpop.permute.xlu1 %719 }
0x10a4   :  { %v1349_v50 = vrot.slane %v1348_v13, 2  ;;  %v722_v7 = vmul.f32 %v2933_v62, %v2608_v15  ;;  %v723_v14 = vmul.f32 %v2933_v62, %v2610_v42 }
0x10a6   :  { %v1350_v58 = vadd.f32 %v1349_v50, %v1348_v13 }
0x10a7   :  { %v780_v23 = vpop.permute.xlu1 %779 }
0x10a8   :  { %v1351_v21 = vrot.slane %v1350_v58, 1  ;;  %v782_v25 = vmul.f32 %v780_v23, %v2730_v53  ;;  %v783_v43 = vmul.f32 %v780_v23, %v2733_v54 }
0x10aa   :  { %v1352_v29 = vadd.f32 %v1351_v21, %v1350_v58 }
0x10ab   :  { %v2937_v36 = vpop.permute.xlu1 %786 }
0x10ac   :  { %v789_v37 = vadd.f32 %v2937_v36, %v782_v25  ;;  %v790_v52 = vadd.f32 %v2937_v36, %v783_v43  ;;  %1697 = vpush %v1352_v29 }
0x10ae   :  { %v793_v38 = vadd.f32 %v789_v37, %v86_v3  ;;  %v794_v18 = vadd.f32 %v790_v52, %v87_v5 }
0x10b0   :  { %vm797_vm3 = vcmp.gt.f32.partialorder %v793_v38, 0.0  ;;  %vm798_vm7 = vcmp.gt.f32.partialorder %v794_v18, 0.0  ;;  %v801_v57 = vmul.f32 0.2, %v793_v38  ;;  %v802_v53 = vmul.f32 0.2, %v794_v18 }
0x10b2   :  { %v805_v40 = vsel %vm797_vm3, %v793_v38, %v801_v57  ;;  %v806_v54 = vsel %vm798_vm7, %v794_v18, %v802_v53 }
0x10b3   :  { %809 = vst [vmem:[%s3013_s7 + $0x10] sm:$0xff] %v805_v40  ;;  %810 = vst [vmem:[%s3013_s7 + $0x18] sm:$0xff] %v806_v54 }
0x10dd   :  { %s1698_s13 = spop %1697 }
0x10de   :  { %s1356_s0 = smul.f32 0.0004885198, %s1698_s13 }
0x10e0   :  { %v1357_v3 = vstv %s1356_s0 }
0x10e1   :  { %2076 = vrsqrt.f32 %v1357_v3  ;;  %vm1360_vm15 = vcmp.eq.f32.partialorder %v1357_v3, inf  ;;  %v1363_v41 = vand.u32 2147483648, %v1357_v3  ;;  %vm1362_vm6 = vcmp.eq.f32.partialorder %v1357_v3, 0.0 }
0x10eb   :  { %v2077_v1 = vpop.eup %2076 }
0x10ec   :  { %v1359_v5 = vmul.f32 %v2077_v1, %v1357_v3 }
0x10ee   :  { %v1361_v10 = vsel %vm1360_vm15, %v1357_v3, %v1359_v5 }
0x10ef   :  { %v1364_v44 = vsel %vm1362_vm6, %v1363_v41, %v1361_v10 }
0x10f0   :  { %1699 = vpush %v1364_v44 }
0x1121   :  { %s1700_s14 = spop %1699 }
0x1122   :  { %s1366_s15 = sadd.f32 1e-10, %s1700_s14 }
0x1124   :  { %v1367_v24 = vstv %s1366_s15 }
0x1125   :  { %2078 = vrcp.f32 %v1367_v24 }
0x112f   :  { %v2079_v47 = vpop.eup %2078 }
0x1130   :  { %1701 = vpush %v2079_v47 }
0x1131   :  { %1703 = vpush %v1389_v17 }
0x1161   :  { %s1702_s16 = spop %1701 }
0x1162   :  { %s1704_s1 = spop %1703  ;;  %v1370_v63 = vstv %s1702_s16 }
0x1163   :  { %s1393_s17 = smul.f32 0.00048828125, %s1704_s1 }
0x1165   :  { %v1394_v8 = vstv %s1393_s17 }
0x1166   :  { %v2952_v34 = vsub.f32 %v2902_v30, %v1394_v8  ;;  %v2955_v61 = vsub.f32 %v2904_v45, %v1394_v8  ;;  %v1371_v30 = vmul.f32 %v1370_v63, %v2919_v55 }
0x1168   :  { %v1397_v32 = vmul.f32 %v2952_v34, %v2952_v34  ;;  %v1398_v48 = vmul.f32 %v2955_v61, %v2955_v61 }
0x116a   :  { %v1399_v9 = vadd.f32 %v1398_v48, %v1397_v32 }
0x116c   :  { %1400 = vadd.xlane.f32.xlu0 %v1399_v9 }
0x1182   :  { %726 = vperm.xlu0 %1801, %v80_v26  }
0x1186   :  { %1374 = vperm.xlu0 %1801, %v1371_v30  }
0x11f9   :  { %v1401_v22 = vpop.xlane.xlu0 %1400 }
0x11fa   :  { %v1402_v45 = vrot.slane %v1401_v22, 4 }
0x11fc   :  { %v1403_v19 = vadd.f32 %v1402_v45, %v1401_v22 }
0x11fe   :  { %v1404_v6 = vrot.slane %v1403_v19, 2 }
0x1200   :  { %v1405_v11 = vadd.f32 %v1404_v6, %v1403_v19 }
0x1201   :  { %v727_v13 = vpop.permute.xlu0 %726 }
0x1202   :  { %v729_v50 = vadd.f32 %v727_v13, %v722_v7  ;;  %v730_v58 = vadd.f32 %v727_v13, %v723_v14  ;;  %v1406_v23 = vrot.slane %v1405_v11, 1 }
0x1204   :  { %v791_v21 = vadd.f32 %v729_v50, %v84_v2  ;;  %v792_v55 = vadd.f32 %v730_v58, %v85_v4  ;;  %v1407_v25 = vadd.f32 %v1406_v23, %v1405_v11 }
0x1205   :  { %v1375_v43 = vpop.permute.xlu0 %1374 }
0x1206   :  { %vm795_vm1 = vcmp.gt.f32.partialorder %v791_v21, 0.0  ;;  %vm796_vm0 = vcmp.gt.f32.partialorder %v792_v55, 0.0  ;;  %v799_v29 = vmul.f32 0.2, %v791_v21  ;;  %v800_v15 = vmul.f32 0.2, %v792_v55  ;;  %1705 = vpush %v1407_v25 }
0x1207   :  { %v1377_v42 = vmul.f32 %v1375_v43, %v2908_v49  ;;  %v1378_v62 = vmul.f32 %v1375_v43, %v2910_v33 }
0x1208   :  { %v803_v37 = vsel %vm795_vm1, %v791_v21, %v799_v29  ;;  %v804_v52 = vsel %vm796_vm0, %v792_v55, %v800_v15 }
0x1209   :  { %807 = vst [vmem:[%s3013_s7] sm:$0xff] %v803_v37  ;;  %808 = vst [vmem:[%s3013_s7 + $0x8] sm:$0xff] %v804_v52  ;;  %v1379_v0 = vadd.f32 %v1377_v42, %v727_v13  ;;  %v1380_v2 = vadd.f32 %v1378_v62, %v727_v13 }
0x120b   :  { %v1436_v4 = vadd.f32 %v1379_v0, %v814_v59  ;;  %v1437_v49 = vadd.f32 %v1380_v2, %v815_v35 }
0x120d   :  { %vm1440_vm5 = vcmp.gt.f32.partialorder %v1436_v4, 0.0  ;;  %vm1441_vm9 = vcmp.gt.f32.partialorder %v1437_v49, 0.0  ;;  %v1444_v33 = vmul.f32 0.2, %v1436_v4  ;;  %v1445_v38 = vmul.f32 0.2, %v1437_v49 }
0x120f   :  { %v1448_v18 = vsel %vm1440_vm5, %v1436_v4, %v1444_v33  ;;  %v1449_v57 = vsel %vm1441_vm9, %v1437_v49, %v1445_v38 }
0x1210   :  { %1643 = vst [vmem:[%s3013_s7 + $0x20] sm:$0xff] %v1448_v18  ;;  %1644 = vst [vmem:[%s3013_s7 + $0x28] sm:$0xff] %v1449_v57 }
0x1237   :  { %s1706_s28 = spop %1705 }
0x1238   :  { %s1411_s4 = smul.f32 0.0004885198, %s1706_s28 }
0x123a   :  { %v1412_v59 = vstv %s1411_s4 }
0x123b   :  { %2080 = vrsqrt.f32 %v1412_v59  ;;  %vm1415_vm10 = vcmp.eq.f32.partialorder %v1412_v59, inf  ;;  %v1418_v53 = vand.u32 2147483648, %v1412_v59  ;;  %vm1417_vm12 = vcmp.eq.f32.partialorder %v1412_v59, 0.0 }
0x1245   :  { %v2081_v56 = vpop.eup %2080 }
0x1246   :  { %v1414_v35 = vmul.f32 %v2081_v56, %v1412_v59 }
0x1248   :  { %v1416_v40 = vsel %vm1415_vm10, %v1412_v59, %v1414_v35 }
0x1249   :  { %v1419_v54 = vsel %vm1417_vm12, %v1418_v53, %v1416_v40 }
0x124a   :  { %1707 = vpush %v1419_v54 }
0x127b   :  { %s1708_s29 = spop %1707 }
0x127c   :  { %s1421_s30 = sadd.f32 1e-10, %s1708_s29 }
0x127e   :  { %v1422_v3 = vstv %s1421_s30 }
0x127f   :  { %2082 = vrcp.f32 %v1422_v3 }
0x1289   :  { %v2083_v1 = vpop.eup %2082 }
0x128a   :  { %1709 = vpush %v2083_v1 }
0x12bb   :  { %s1710_s8 = spop %1709 }
0x12bc   :  { %v1425_v5 = vstv %s1710_s8 }
0x12bd   :  { %v1426_v41 = vmul.f32 %v1425_v5, %v2926_v39 }
0x12bf   :  { %1429 = vperm.xlu1 %1800, %v1426_v41  }
0x133e   :  { %v1430_v10 = vpop.permute.xlu1 %1429 }
0x133f   :  { %v1432_v44 = vmul.f32 %v1430_v10, %v2952_v34  ;;  %v1433_v28 = vmul.f32 %v1430_v10, %v2955_v61 }
0x1341   :  { %v1434_v16 = vadd.f32 %v1432_v44, %v2937_v36  ;;  %v1435_v27 = vadd.f32 %v1433_v28, %v2937_v36 }
0x1343   :  { %v1438_v12 = vadd.f32 %v1434_v16, %v816_v60  ;;  %v1439_v24 = vadd.f32 %v1435_v27, %v817_v20 }
0x1345   :  { %vm1442_vm14 = vcmp.gt.f32.partialorder %v1438_v12, 0.0  ;;  %vm1443_vm13 = vcmp.gt.f32.partialorder %v1439_v24, 0.0  ;;  %v1446_v46 = vmul.f32 0.2, %v1438_v12  ;;  %v1447_v39 = vmul.f32 0.2, %v1439_v24 }
0x1347   :  { %v1450_v51 = vsel %vm1442_vm14, %v1438_v12, %v1446_v46  ;;  %v1451_v47 = vsel %vm1443_vm13, %v1439_v24, %v1447_v39 }
0x1348   :  { %1645 = vst [vmem:[%s3013_s7 + $0x30] sm:$0xff] %v1450_v51  ;;  %1646 = vst [vmem:[%s3013_s7 + $0x38] sm:$0xff] %v1451_v47 }

</bundles_post_ra>
